<compile_context>
chip_gen: v7x
topology: tpu7x:2x2x1
jax: 0.10.0
libtpu: 0.0.40
codegen_flags: <defaults>
</compile_context>

<pallas_src>
import math
import functools
import numpy as np

import jax
import jax.numpy as jnp
from jax import lax
from jax.experimental import pallas as pl
from jax.experimental.pallas import tpu as pltpu


# ----------------------------------------------------------------------------
# Kernel
# ----------------------------------------------------------------------------
def _layer_norm(v, g, b, eps=1e-5):
    mu = jnp.mean(v, axis=-1, keepdims=True)
    var = jnp.mean((v - mu) ** 2, axis=-1, keepdims=True)
    return (v - mu) * lax.rsqrt(var + eps) * g + b


def _txl_kernel(xm_ref, mb_ref,
                ln1_g_ref, ln1_b_ref,
                wq_ref, wk_ref, wv_ref, bv_ref, qpb_ref,
                ewp_ref, bwp_ref,
                wo_ref, bo_ref,
                ln2_g_ref, ln2_b_ref,
                w1_ref, b1_ref, w2_ref, b2_ref,
                o_ref,
                oh_ref,
                *, Bt, S, M, KL, D, H, DK, scale):
    f32 = jnp.float32
    T = M + S                      # rows per batch entry (mem + x); == KL
    Wp = KL + 1                    # zero-padded rel-pos axis per head

    xm = xm_ref[...].reshape(Bt * T, D)            # raw [mem; x] rows
    g1, be1 = ln1_g_ref[...], ln1_b_ref[...]

    # single pre-LN over mem and x rows
    ln1 = _layer_norm(xm, g1, be1)                 # [Bt*T, D]

    # single K / V projections over ALL rows (per-batch K/V = contiguous block)
    k_all = jnp.dot(ln1, wk_ref[...], preferred_element_type=f32)          # [Bt*T, D]
    v_all = jnp.dot(ln1, wv_ref[...], preferred_element_type=f32) + bv_ref[...]

    # z (normed x) and residual x rows (sublane-aligned static slices)
    if Bt == 1:
        z = ln1[M:M + S]
        x_res = xm[M:M + S]
    else:
        z = jnp.concatenate([ln1[b * T + M: b * T + M + S] for b in range(Bt)], axis=0)
        x_res = jnp.concatenate([xm[b * T + M: b * T + M + S] for b in range(Bt)], axis=0)

    # Q with 1/sqrt(DK) folded in once (qpb / pos-bias pre-scaled on the host)
    q_s = jnp.dot(z, wq_ref[...], preferred_element_type=f32) * scale      # [Bt*S, D]
    qb_s = q_s + qpb_ref[...]                                              # content-term query

    # relative-position table for ALL heads / batch rows in one MXU matmul:
    # ewp is block-diagonal [D, H*(KL+1)]; column KL of each head block is the
    # zero pad column that produces the shift_right zero diagonal.
    bp_all = jnp.dot(q_s, ewp_ref[...], preferred_element_type=f32) + bwp_ref[...]

    # TODO(synk): switch to lax.fori_loop(..., unroll=True) if Bt*H grows.
    for b in range(Bt):
        r0 = b * S
        kv0 = b * T
        mbias = mb_ref[b]                                                  # [S, KL]
        for h in range(H):
            c0 = h * DK
            qh = qb_s[r0:r0 + S, c0:c0 + DK]                               # [S, DK]
            kh = k_all[kv0:kv0 + KL, c0:c0 + DK]                           # [KL, DK]
            vh = v_all[kv0:kv0 + KL, c0:c0 + DK]                           # [KL, DK]

            # content term (q + query_pos_bias) @ K^T, pre-scaled
            ac = lax.dot_general(qh, kh, (((1,), (1,)), ((), ())),
                                 preferred_element_type=f32)               # [S, KL]

            # exact Transformer-XL shift (flattened-window view of shift_right):
            #   row 0 :  Bp[0, 0:KL]
            #   row i :  [ Bp[i-1, KL+1-i : KL+1] , Bp[i, 0 : KL-i] ]
            bp = bp_all[r0:r0 + S, h * Wp:(h + 1) * Wp]                    # [S, KL+1]
            rows = [bp[0:1, 0:KL]]
            for i in range(1, S):
                rows.append(jnp.concatenate(
                    [bp[i - 1:i, KL + 1 - i:KL + 1], bp[i:i + 1, 0:KL - i]], axis=1))
            bd = jnp.concatenate(rows, axis=0)                             # [S, KL]

            s = ac + bd + mbias
            s_max = jnp.max(s, axis=-1, keepdims=True)
            e = jnp.exp(s - s_max)
            attn = e * pl.reciprocal(jnp.sum(e, axis=-1, keepdims=True), approx=True)

            # write head output at its column offset (no list+concat live ranges)
            oh_ref[r0:r0 + S, c0:c0 + DK] = jnp.dot(attn, vh,
                                                    preferred_element_type=f32)

    # one output projection over all rows / heads
    proj = jnp.dot(oh_ref[...], wo_ref[...], preferred_element_type=f32) + bo_ref[...]
    x1 = x_res + proj                                                      # residual 1

    # pre-LN feed-forward (Linear -> ReLU -> Linear), residual 2
    z2 = _layer_norm(x1, ln2_g_ref[...], ln2_b_ref[...])
    hdn = jnp.maximum(
        jnp.dot(z2, w1_ref[...], preferred_element_type=f32) + b1_ref[...], 0.0)
    ff = jnp.dot(hdn, w2_ref[...], preferred_element_type=f32) + b2_ref[...]

    o_ref[...] = (x1 + ff).reshape(Bt, S, D)


# ----------------------------------------------------------------------------
# Wrapper (layout glue + tiny block-diagonal widened positional table)
# ----------------------------------------------------------------------------
def transformer_xl_layer(x_sbd, mem_sbd, mask_sqkb, params, *, block_b=1):
    """x: [S,B,D], mem: [M,B,D], mask: [S,KL,B] -> [S,B,D]."""
    # TODO(synk): mem=None path (m_z = z) is not specialized; pass mem explicitly.
    S, B, D = x_sbd.shape
    M = mem_sbd.shape[0]
    KL = S + M
    H = params['heads']
    DK = D // H
    assert B % block_b == 0
    emb = np.asarray(params['key_pos_emb'], np.float32)       # [KL, H, DK]
    pbias = np.asarray(params['key_pos_bias'], np.float32)    # [KL, H]
    assert emb.shape[0] == KL, "kernel assumes key_pos_emb has exactly key_len rows"
    scale = 1.0 / math.sqrt(DK)
    Wp = KL + 1

    f32 = jnp.float32
    x_b = jnp.transpose(x_sbd, (1, 0, 2)).astype(f32)          # [B, S, D]
    mem_b = jnp.transpose(mem_sbd, (1, 0, 2)).astype(f32)      # [B, M, D]
    xm_b = jnp.concatenate([mem_b, x_b], axis=1)               # [B, M+S, D]
    mask_b = jnp.transpose(mask_sqkb, (2, 0, 1))               # [B, S, KL]
    maskbias = jnp.where(mask_b > 0, 0.0, -1e30).astype(f32)   # additive mask bias

    # block-diagonal widened positional table: per head [DK, KL] = emb_h^T plus a
    # zero pad column (the shift_right zero); bias carries the 1/sqrt(DK) scale.
    ewp = np.zeros((D, H * Wp), np.float32)
    bwp = np.zeros((1, H * Wp), np.float32)
    for h in range(H):
        ewp[h * DK:(h + 1) * DK, h * Wp:h * Wp + KL] = emb[:, h, :].T
        bwp[0, h * Wp:h * Wp + KL] = pbias[:, h] * scale
    qpb_s = np.asarray(params['qpb'], np.float32).reshape(1, D) * scale

    def as2d(a):
        return jnp.asarray(a, f32).reshape(1, -1)

    args = (
        xm_b, maskbias,
        as2d(params['ln1_g']), as2d(params['ln1_b']),
        jnp.asarray(params['wq'], f32), jnp.asarray(params['wk'], f32),
        jnp.asarray(params['wv'], f32), as2d(params['bv']),
        jnp.asarray(qpb_s),
        jnp.asarray(ewp), jnp.asarray(bwp),
        jnp.asarray(params['wo'], f32), as2d(params['bo']),
        as2d(params['ln2_g']), as2d(params['ln2_b']),
        jnp.asarray(params['w1'], f32), as2d(params['b1f']),
        jnp.asarray(params['w2'], f32), as2d(params['b2f']),
    )

    def bspec(shape):
        nd = len(shape)
        return pl.BlockSpec((block_b,) + tuple(shape[1:]),
                            lambda i, _n=nd: (i,) + (0,) * (_n - 1))

    def fspec(shape):
        nd = len(shape)
        return pl.BlockSpec(tuple(shape), lambda i, _n=nd: (0,) * _n)

    in_specs = [bspec(args[0].shape),      # [mem; x]
                bspec(args[1].shape)]      # mask bias
    in_specs += [fspec(a.shape) for a in args[2:]]

    kernel = functools.partial(_txl_kernel, Bt=block_b, S=S, M=M, KL=KL,
                               D=D, H=H, DK=DK, scale=scale)

    out_b = pl.pallas_call(
        kernel,
        out_shape=jax.ShapeDtypeStruct((B, S, D), f32),
        grid_spec=pltpu.PrefetchScalarGridSpec(
            num_scalar_prefetch=0,
            grid=(B // block_b,),
            in_specs=in_specs,
            out_specs=pl.BlockSpec((block_b, S, D), lambda i: (i, 0, 0)),
            scratch_shapes=[pltpu.VMEM((block_b * S, D), jnp.float32)]),
        compiler_params=pltpu.CompilerParams(
            dimension_semantics=("parallel",),
            # raise together with block_b on v5e/v6e (128 MiB); keep <=~56 MiB on v7x
            vmem_limit_bytes=32 * 1024 * 1024),
    )(*args)

    return jnp.transpose(out_b, (1, 0, 2))     # back to [S, B, D]


# ----------------------------------------------------------------------------
# Pure-JAX reference (mirrors the PyTorch / labml code exactly)
# ----------------------------------------------------------------------------
def _shift_right_ref(x):  # [I, J, B, H]
    I, J = x.shape[0], x.shape[1]
    zp = jnp.zeros((I, 1) + x.shape[2:], x.dtype)
    xp = jnp.concatenate([x, zp], axis=1)
    xp = xp.reshape((J + 1, I) + x.shape[2:])
    return xp[:-1].reshape(x.shape)


def ref_forward(x, mem, mask, p):
    def ln(v, g, b):
        mu = v.mean(-1, keepdims=True)
        var = ((v - mu) ** 2).mean(-1, keepdims=True)
        return (v - mu) / jnp.sqrt(var + 1e-5) * g + b

    S, B, D = x.shape
    H = p['heads']
    DK = D // H
    z = ln(x, p['ln1_g'], p['ln1_b'])
    mem_n = ln(mem, p['ln1_g'], p['ln1_b'])
    m_z = jnp.concatenate([mem_n, z], axis=0)
    KL = m_z.shape[0]

    q = (z @ p['wq']).reshape(S, B, H, DK)
    k = (m_z @ p['wk']).reshape(KL, B, H, DK)
    v = (m_z @ p['wv'] + p['bv']).reshape(KL, B, H, DK)

    ac = jnp.einsum('ibhd,jbhd->ijbh', q + p['qpb'][None, None], k)
    b_t = jnp.einsum('ibhd,jhd->ijbh', q, p['key_pos_emb'])
    d_t = p['key_pos_bias'][None, :, None, :]
    bd = _shift_right_ref(b_t + d_t)[:, -KL:]

    scores = (ac + bd) * (1.0 / math.sqrt(DK))
    scores = jnp.where(mask[..., None] > 0, scores, -1e30)
    attn = jax.nn.softmax(scores, axis=1)
    o = jnp.einsum('ijbh,jbhd->ibhd', attn, v).reshape(S, B, D)
    x1 = x + (o @ p['wo'] + p['bo'])

    z2 = ln(x1, p['ln2_g'], p['ln2_b'])
    ff = jnp.maximum(z2 @ p['w1'] + p['b1f'], 0.0) @ p['w2'] + p['b2f']
    return x1 + ff


# ----------------------------------------------------------------------------
# Main
# ----------------------------------------------------------------------------
if __name__ == "__main__":
    S, MLEN, B, D, H, DFF = 8, 8, 2, 32, 4, 64
    DK = D // H
    KL = S + MLEN

    key = jax.random.PRNGKey(0)
    ks = jax.random.split(key, 20)

    def nrm(k, shape, scale):
        return jax.random.normal(k, shape, jnp.float32) * scale

    params = {
        'heads': H,
        'ln1_g': 1.0 + 0.1 * nrm(ks[0], (D,), 1.0),
        'ln1_b': 0.1 * nrm(ks[1], (D,), 1.0),
        'wq': nrm(ks[2], (D, D), 1.0 / math.sqrt(D)),
        'wk': nrm(ks[3], (D, D), 1.0 / math.sqrt(D)),
        'wv': nrm(ks[4], (D, D), 1.0 / math.sqrt(D)),
        'bv': nrm(ks[5], (D,), 0.05),
        'qpb': nrm(ks[6], (H, DK), 0.1),
        'key_pos_emb': nrm(ks[7], (KL, H, DK), 0.1),
        'key_pos_bias': nrm(ks[8], (KL, H), 0.1),
        'wo': nrm(ks[9], (D, D), 1.0 / math.sqrt(D)),
        'bo': nrm(ks[10], (D,), 0.05),
        'ln2_g': 1.0 + 0.1 * nrm(ks[11], (D,), 1.0),
        'ln2_b': 0.1 * nrm(ks[12], (D,), 1.0),
        'w1': nrm(ks[13], (D, DFF), 1.0 / math.sqrt(D)),
        'b1f': nrm(ks[14], (DFF,), 0.05),
        'w2': nrm(ks[15], (DFF, D), 1.0 / math.sqrt(DFF)),
        'b2f': nrm(ks[16], (D,), 0.05),
    }

    x = jax.random.normal(ks[17], (S, B, D), jnp.float32)
    mem = jax.random.normal(ks[18], (MLEN, B, D), jnp.float32)

    # Transformer-XL causal mask: query i may attend to keys j <= i + mem_len
    ii = np.arange(S)[:, None]
    jj = np.arange(KL)[None, :]
    mask_np = (jj <= ii + MLEN).astype(np.float32)            # [S, KL]
    mask = jnp.asarray(np.broadcast_to(mask_np[:, :, None], (S, KL, B)).copy())

    out = transformer_xl_layer(x, mem, mask, params, block_b=1)
    out = jax.block_until_ready(out)

    with jax.default_matmul_precision("highest"):
        ref = jax.block_until_ready(ref_forward(x, mem, mask, params))

    err = float(jnp.max(jnp.abs(out - ref)))
    if not np.isfinite(err) or err > 5e-3:
        raise AssertionError(f"kernel/reference mismatch: max abs err = {err}")

    print("KERNEL_OK")
</pallas_src>

<mosaic_0001>
module attributes {stable_mosaic.version = 11 : i64} {
  func.func @_txl_kernel(%arg0: i32, %arg1: memref<1x16x32xf32, #tpu.memory_space<vmem>>, %arg2: memref<1x8x16xf32, #tpu.memory_space<vmem>>, %arg3: memref<1x32xf32, #tpu.memory_space<vmem>>, %arg4: memref<1x32xf32, #tpu.memory_space<vmem>>, %arg5: memref<32x32xf32, #tpu.memory_space<vmem>>, %arg6: memref<32x32xf32, #tpu.memory_space<vmem>>, %arg7: memref<32x32xf32, #tpu.memory_space<vmem>>, %arg8: memref<1x32xf32, #tpu.memory_space<vmem>>, %arg9: memref<1x32xf32, #tpu.memory_space<vmem>>, %arg10: memref<32x68xf32, #tpu.memory_space<vmem>>, %arg11: memref<1x68xf32, #tpu.memory_space<vmem>>, %arg12: memref<32x32xf32, #tpu.memory_space<vmem>>, %arg13: memref<1x32xf32, #tpu.memory_space<vmem>>, %arg14: memref<1x32xf32, #tpu.memory_space<vmem>>, %arg15: memref<1x32xf32, #tpu.memory_space<vmem>>, %arg16: memref<32x64xf32, #tpu.memory_space<vmem>>, %arg17: memref<1x64xf32, #tpu.memory_space<vmem>>, %arg18: memref<64x32xf32, #tpu.memory_space<vmem>>, %arg19: memref<1x32xf32, #tpu.memory_space<vmem>>, %arg20: memref<1x8x32xf32, #tpu.memory_space<vmem>>, %arg21: memref<8x32xf32, #tpu.memory_space<vmem>>) attributes {dimension_semantics = [#tpu.dimension_semantics<parallel>], iteration_bounds = array<i64: 2>, scalar_prefetch = 0 : i64, scratch_operands = 1 : i64, tpu.core_type = #tpu.core_type<tc>, window_params = [{transform_indices = @transform_0, window_bounds = array<i64: 1, 16, 32>}, {transform_indices = @transform_1, window_bounds = array<i64: 1, 8, 16>}, {pipeline_mode = #tpu.pipeline_mode<synchronous>, transform_indices = @transform_2, window_bounds = array<i64: 1, 32>}, {pipeline_mode = #tpu.pipeline_mode<synchronous>, transform_indices = @transform_3, window_bounds = array<i64: 1, 32>}, {pipeline_mode = #tpu.pipeline_mode<synchronous>, transform_indices = @transform_4, window_bounds = array<i64: 32, 32>}, {pipeline_mode = #tpu.pipeline_mode<synchronous>, transform_indices = @transform_5, window_bounds = array<i64: 32, 32>}, {pipeline_mode = #tpu.pipeline_mode<synchronous>, transform_indices = @transform_6, window_bounds = array<i64: 32, 32>}, {pipeline_mode = #tpu.pipeline_mode<synchronous>, transform_indices = @transform_7, window_bounds = array<i64: 1, 32>}, {pipeline_mode = #tpu.pipeline_mode<synchronous>, transform_indices = @transform_8, window_bounds = array<i64: 1, 32>}, {pipeline_mode = #tpu.pipeline_mode<synchronous>, transform_indices = @transform_9, window_bounds = array<i64: 32, 68>}, {pipeline_mode = #tpu.pipeline_mode<synchronous>, transform_indices = @transform_10, window_bounds = array<i64: 1, 68>}, {pipeline_mode = #tpu.pipeline_mode<synchronous>, transform_indices = @transform_11, window_bounds = array<i64: 32, 32>}, {pipeline_mode = #tpu.pipeline_mode<synchronous>, transform_indices = @transform_12, window_bounds = array<i64: 1, 32>}, {pipeline_mode = #tpu.pipeline_mode<synchronous>, transform_indices = @transform_13, window_bounds = array<i64: 1, 32>}, {pipeline_mode = #tpu.pipeline_mode<synchronous>, transform_indices = @transform_14, window_bounds = array<i64: 1, 32>}, {pipeline_mode = #tpu.pipeline_mode<synchronous>, transform_indices = @transform_15, window_bounds = array<i64: 32, 64>}, {pipeline_mode = #tpu.pipeline_mode<synchronous>, transform_indices = @transform_16, window_bounds = array<i64: 1, 64>}, {pipeline_mode = #tpu.pipeline_mode<synchronous>, transform_indices = @transform_17, window_bounds = array<i64: 64, 32>}, {pipeline_mode = #tpu.pipeline_mode<synchronous>, transform_indices = @transform_18, window_bounds = array<i64: 1, 32>}, {transform_indices = @transform_19, window_bounds = array<i64: 1, 8, 32>}]} {
    %c0 = arith.constant 0 : index
    %c0_0 = arith.constant 0 : index
    %c0_1 = arith.constant 0 : index
    %0 = vector.load %arg1[%c0, %c0_0, %c0_1] : memref<1x16x32xf32, #tpu.memory_space<vmem>>, vector<1x16x32xf32>
    %1 = vector.shape_cast %0 : vector<1x16x32xf32> to vector<16x32xf32>
    %c0_2 = arith.constant 0 : index
    %c0_3 = arith.constant 0 : index
    %2 = vector.load %arg3[%c0_2, %c0_3] : memref<1x32xf32, #tpu.memory_space<vmem>>, vector<1x32xf32>
    %c0_4 = arith.constant 0 : index
    %c0_5 = arith.constant 0 : index
    %3 = vector.load %arg4[%c0_4, %c0_5] : memref<1x32xf32, #tpu.memory_space<vmem>>, vector<1x32xf32>
    %cst = arith.constant dense<0.000000e+00> : vector<16xf32>
    %4 = vector.multi_reduction <add>, %1, %cst [1] : vector<16x32xf32> to vector<16xf32>
    %5 = vector.shape_cast %4 : vector<16xf32> to vector<16x1xf32>
    %cst_6 = arith.constant 3.200000e+01 : f32
    %6 = vector.broadcast %cst_6 : f32 to vector<16x1xf32>
    %7 = arith.divf %5, %6 : vector<16x1xf32>
    %8 = vector.broadcast %7 : vector<16x1xf32> to vector<16x32xf32>
    %9 = arith.subf %1, %8 : vector<16x32xf32>
    %10 = arith.mulf %9, %9 : vector<16x32xf32>
    %cst_7 = arith.constant dense<0.000000e+00> : vector<16xf32>
    %11 = vector.multi_reduction <add>, %10, %cst_7 [1] : vector<16x32xf32> to vector<16xf32>
    %12 = vector.shape_cast %11 : vector<16xf32> to vector<16x1xf32>
    %cst_8 = arith.constant 3.200000e+01 : f32
    %13 = vector.broadcast %cst_8 : f32 to vector<16x1xf32>
    %14 = arith.divf %12, %13 : vector<16x1xf32>
    %15 = vector.broadcast %7 : vector<16x1xf32> to vector<16x32xf32>
    %16 = arith.subf %1, %15 : vector<16x32xf32>
    %cst_9 = arith.constant 9.99999974E-6 : f32
    %17 = vector.broadcast %cst_9 : f32 to vector<16x1xf32>
    %18 = arith.addf %14, %17 : vector<16x1xf32>
    %19 = math.rsqrt %18 : vector<16x1xf32>
    %20 = vector.broadcast %19 : vector<16x1xf32> to vector<16x32xf32>
    %21 = arith.mulf %16, %20 : vector<16x32xf32>
    %22 = vector.broadcast %2 : vector<1x32xf32> to vector<16x32xf32>
    %23 = arith.mulf %21, %22 : vector<16x32xf32>
    %24 = vector.broadcast %3 : vector<1x32xf32> to vector<16x32xf32>
    %25 = arith.addf %23, %24 : vector<16x32xf32>
    %c0_10 = arith.constant 0 : index
    %c0_11 = arith.constant 0 : index
    %26 = vector.load %arg6[%c0_10, %c0_11] : memref<32x32xf32, #tpu.memory_space<vmem>>, vector<32x32xf32>
    %cst_12 = arith.constant dense<0.000000e+00> : vector<16x32xf32>
    %27 = tpu.matmul %25, %26, %cst_12 {dimension_numbers = #tpu.dot_dimension_numbers<[1], [0], [0], [1], [0, 0, 1, 1], [], []>} : vector<16x32xf32>, vector<32x32xf32>, vector<16x32xf32> -> vector<16x32xf32>
    %c0_13 = arith.constant 0 : index
    %c0_14 = arith.constant 0 : index
    %28 = vector.load %arg7[%c0_13, %c0_14] : memref<32x32xf32, #tpu.memory_space<vmem>>, vector<32x32xf32>
    %cst_15 = arith.constant dense<0.000000e+00> : vector<16x32xf32>
    %29 = tpu.matmul %25, %28, %cst_15 {dimension_numbers = #tpu.dot_dimension_numbers<[1], [0], [0], [1], [0, 0, 1, 1], [], []>} : vector<16x32xf32>, vector<32x32xf32>, vector<16x32xf32> -> vector<16x32xf32>
    %c0_16 = arith.constant 0 : index
    %c0_17 = arith.constant 0 : index
    %30 = vector.load %arg8[%c0_16, %c0_17] : memref<1x32xf32, #tpu.memory_space<vmem>>, vector<1x32xf32>
    %31 = vector.broadcast %30 : vector<1x32xf32> to vector<16x32xf32>
    %32 = arith.addf %29, %31 : vector<16x32xf32>
    %33 = vector.extract_strided_slice %25 {offsets = [8, 0], sizes = [8, 32], strides = [1, 1]} : vector<16x32xf32> to vector<8x32xf32>
    %34 = vector.extract_strided_slice %1 {offsets = [8, 0], sizes = [8, 32], strides = [1, 1]} : vector<16x32xf32> to vector<8x32xf32>
    %c0_18 = arith.constant 0 : index
    %c0_19 = arith.constant 0 : index
    %35 = vector.load %arg5[%c0_18, %c0_19] : memref<32x32xf32, #tpu.memory_space<vmem>>, vector<32x32xf32>
    %cst_20 = arith.constant dense<0.000000e+00> : vector<8x32xf32>
    %36 = tpu.matmul %33, %35, %cst_20 {dimension_numbers = #tpu.dot_dimension_numbers<[1], [0], [0], [1], [0, 0, 1, 1], [], []>} : vector<8x32xf32>, vector<32x32xf32>, vector<8x32xf32> -> vector<8x32xf32>
    %cst_21 = arith.constant 0.353553385 : f32
    %37 = vector.broadcast %cst_21 : f32 to vector<8x32xf32>
    %38 = arith.mulf %36, %37 : vector<8x32xf32>
    %c0_22 = arith.constant 0 : index
    %c0_23 = arith.constant 0 : index
    %39 = vector.load %arg9[%c0_22, %c0_23] : memref<1x32xf32, #tpu.memory_space<vmem>>, vector<1x32xf32>
    %40 = vector.broadcast %39 : vector<1x32xf32> to vector<8x32xf32>
    %41 = arith.addf %38, %40 : vector<8x32xf32>
    %c0_24 = arith.constant 0 : index
    %c0_25 = arith.constant 0 : index
    %42 = vector.load %arg10[%c0_24, %c0_25] : memref<32x68xf32, #tpu.memory_space<vmem>>, vector<32x68xf32>
    %cst_26 = arith.constant dense<0.000000e+00> : vector<8x68xf32>
    %43 = tpu.matmul %38, %42, %cst_26 {dimension_numbers = #tpu.dot_dimension_numbers<[1], [0], [0], [1], [0, 0, 1, 1], [], []>} : vector<8x32xf32>, vector<32x68xf32>, vector<8x68xf32> -> vector<8x68xf32>
    %c0_27 = arith.constant 0 : index
    %c0_28 = arith.constant 0 : index
    %44 = vector.load %arg11[%c0_27, %c0_28] : memref<1x68xf32, #tpu.memory_space<vmem>>, vector<1x68xf32>
    %45 = vector.broadcast %44 : vector<1x68xf32> to vector<8x68xf32>
    %46 = arith.addf %43, %45 : vector<8x68xf32>
    %c0_29 = arith.constant 0 : index
    %c0_30 = arith.constant 0 : index
    %c0_31 = arith.constant 0 : index
    %47 = vector.load %arg2[%c0_29, %c0_30, %c0_31] : memref<1x8x16xf32, #tpu.memory_space<vmem>>, vector<1x8x16xf32>
    %48 = vector.shape_cast %47 : vector<1x8x16xf32> to vector<8x16xf32>
    %49 = vector.extract_strided_slice %41 {offsets = [0, 0], sizes = [8, 8], strides = [1, 1]} : vector<8x32xf32> to vector<8x8xf32>
    %50 = vector.extract_strided_slice %27 {offsets = [0, 0], sizes = [16, 8], strides = [1, 1]} : vector<16x32xf32> to vector<16x8xf32>
    %51 = vector.extract_strided_slice %32 {offsets = [0, 0], sizes = [16, 8], strides = [1, 1]} : vector<16x32xf32> to vector<16x8xf32>
    %cst_32 = arith.constant dense<0.000000e+00> : vector<8x16xf32>
    %52 = tpu.matmul %49, %50, %cst_32 {dimension_numbers = #tpu.dot_dimension_numbers<[1], [1], [0], [0], [0, 0, 1, 0], [], []>} : vector<8x8xf32>, vector<16x8xf32>, vector<8x16xf32> -> vector<8x16xf32>
    %53 = vector.extract_strided_slice %46 {offsets = [0, 0], sizes = [8, 17], strides = [1, 1]} : vector<8x68xf32> to vector<8x17xf32>
    %54 = vector.extract_strided_slice %53 {offsets = [0, 0], sizes = [1, 16], strides = [1, 1]} : vector<8x17xf32> to vector<1x16xf32>
    %55 = vector.extract_strided_slice %53 {offsets = [0, 16], sizes = [1, 1], strides = [1, 1]} : vector<8x17xf32> to vector<1x1xf32>
    %56 = vector.extract_strided_slice %53 {offsets = [1, 0], sizes = [1, 15], strides = [1, 1]} : vector<8x17xf32> to vector<1x15xf32>
    %57 = tpu.concatenate %55, %56 in 1 : vector<1x1xf32>, vector<1x15xf32> -> vector<1x16xf32>
    %58 = vector.extract_strided_slice %53 {offsets = [1, 15], sizes = [1, 2], strides = [1, 1]} : vector<8x17xf32> to vector<1x2xf32>
    %59 = vector.extract_strided_slice %53 {offsets = [2, 0], sizes = [1, 14], strides = [1, 1]} : vector<8x17xf32> to vector<1x14xf32>
    %60 = tpu.concatenate %58, %59 in 1 : vector<1x2xf32>, vector<1x14xf32> -> vector<1x16xf32>
    %61 = vector.extract_strided_slice %53 {offsets = [2, 14], sizes = [1, 3], strides = [1, 1]} : vector<8x17xf32> to vector<1x3xf32>
    %62 = vector.extract_strided_slice %53 {offsets = [3, 0], sizes = [1, 13], strides = [1, 1]} : vector<8x17xf32> to vector<1x13xf32>
    %63 = tpu.concatenate %61, %62 in 1 : vector<1x3xf32>, vector<1x13xf32> -> vector<1x16xf32>
    %64 = vector.extract_strided_slice %53 {offsets = [3, 13], sizes = [1, 4], strides = [1, 1]} : vector<8x17xf32> to vector<1x4xf32>
    %65 = vector.extract_strided_slice %53 {offsets = [4, 0], sizes = [1, 12], strides = [1, 1]} : vector<8x17xf32> to vector<1x12xf32>
    %66 = tpu.concatenate %64, %65 in 1 : vector<1x4xf32>, vector<1x12xf32> -> vector<1x16xf32>
    %67 = vector.extract_strided_slice %53 {offsets = [4, 12], sizes = [1, 5], strides = [1, 1]} : vector<8x17xf32> to vector<1x5xf32>
    %68 = vector.extract_strided_slice %53 {offsets = [5, 0], sizes = [1, 11], strides = [1, 1]} : vector<8x17xf32> to vector<1x11xf32>
    %69 = tpu.concatenate %67, %68 in 1 : vector<1x5xf32>, vector<1x11xf32> -> vector<1x16xf32>
    %70 = vector.extract_strided_slice %53 {offsets = [5, 11], sizes = [1, 6], strides = [1, 1]} : vector<8x17xf32> to vector<1x6xf32>
    %71 = vector.extract_strided_slice %53 {offsets = [6, 0], sizes = [1, 10], strides = [1, 1]} : vector<8x17xf32> to vector<1x10xf32>
    %72 = tpu.concatenate %70, %71 in 1 : vector<1x6xf32>, vector<1x10xf32> -> vector<1x16xf32>
    %73 = vector.extract_strided_slice %53 {offsets = [6, 10], sizes = [1, 7], strides = [1, 1]} : vector<8x17xf32> to vector<1x7xf32>
    %74 = vector.extract_strided_slice %53 {offsets = [7, 0], sizes = [1, 9], strides = [1, 1]} : vector<8x17xf32> to vector<1x9xf32>
    %75 = tpu.concatenate %73, %74 in 1 : vector<1x7xf32>, vector<1x9xf32> -> vector<1x16xf32>
    %76 = tpu.concatenate %54, %57, %60, %63, %66, %69, %72, %75 in 0 : vector<1x16xf32>, vector<1x16xf32>, vector<1x16xf32>, vector<1x16xf32>, vector<1x16xf32>, vector<1x16xf32>, vector<1x16xf32>, vector<1x16xf32> -> vector<8x16xf32>
    %77 = arith.addf %52, %76 : vector<8x16xf32>
    %78 = arith.addf %77, %48 : vector<8x16xf32>
    %cst_33 = arith.constant dense<0xFF800000> : vector<8xf32>
    %79 = vector.multi_reduction <maximumf>, %78, %cst_33 [1] : vector<8x16xf32> to vector<8xf32>
    %80 = vector.shape_cast %79 : vector<8xf32> to vector<8x1xf32>
    %81 = vector.broadcast %80 : vector<8x1xf32> to vector<8x16xf32>
    %82 = arith.subf %78, %81 : vector<8x16xf32>
    %83 = math.exp %82 : vector<8x16xf32>
    %cst_34 = arith.constant dense<0.000000e+00> : vector<8xf32>
    %84 = vector.multi_reduction <add>, %83, %cst_34 [1] : vector<8x16xf32> to vector<8xf32>
    %85 = vector.shape_cast %84 : vector<8xf32> to vector<8x1xf32>
    %86 = tpu.reciprocal %85 {approx = true} : vector<8x1xf32> -> vector<8x1xf32>
    %87 = vector.broadcast %86 : vector<8x1xf32> to vector<8x16xf32>
    %88 = arith.mulf %83, %87 : vector<8x16xf32>
    %cst_35 = arith.constant dense<0.000000e+00> : vector<8x8xf32>
    %89 = tpu.matmul %88, %51, %cst_35 {dimension_numbers = #tpu.dot_dimension_numbers<[1], [0], [0], [1], [0, 0, 1, 1], [], []>} : vector<8x16xf32>, vector<16x8xf32>, vector<8x8xf32> -> vector<8x8xf32>
    %c0_36 = arith.constant 0 : index
    %c0_37 = arith.constant 0 : index
    %90 = vector.load %arg21[%c0_36, %c0_37] : memref<8x32xf32, #tpu.memory_space<vmem>>, vector<8x8xf32>
    tpu.vector_store %arg21[%c0_36, %c0_37], %89 {strides = array<i32>} : memref<8x32xf32, #tpu.memory_space<vmem>>, vector<8x8xf32>,
    %91 = vector.extract_strided_slice %41 {offsets = [0, 8], sizes = [8, 8], strides = [1, 1]} : vector<8x32xf32> to vector<8x8xf32>
    %92 = vector.extract_strided_slice %27 {offsets = [0, 8], sizes = [16, 8], strides = [1, 1]} : vector<16x32xf32> to vector<16x8xf32>
    %93 = vector.extract_strided_slice %32 {offsets = [0, 8], sizes = [16, 8], strides = [1, 1]} : vector<16x32xf32> to vector<16x8xf32>
    %cst_38 = arith.constant dense<0.000000e+00> : vector<8x16xf32>
    %94 = tpu.matmul %91, %92, %cst_38 {dimension_numbers = #tpu.dot_dimension_numbers<[1], [1], [0], [0], [0, 0, 1, 0], [], []>} : vector<8x8xf32>, vector<16x8xf32>, vector<8x16xf32> -> vector<8x16xf32>
    %95 = vector.extract_strided_slice %46 {offsets = [0, 17], sizes = [8, 17], strides = [1, 1]} : vector<8x68xf32> to vector<8x17xf32>
    %96 = vector.extract_strided_slice %95 {offsets = [0, 0], sizes = [1, 16], strides = [1, 1]} : vector<8x17xf32> to vector<1x16xf32>
    %97 = vector.extract_strided_slice %95 {offsets = [0, 16], sizes = [1, 1], strides = [1, 1]} : vector<8x17xf32> to vector<1x1xf32>
    %98 = vector.extract_strided_slice %95 {offsets = [1, 0], sizes = [1, 15], strides = [1, 1]} : vector<8x17xf32> to vector<1x15xf32>
    %99 = tpu.concatenate %97, %98 in 1 : vector<1x1xf32>, vector<1x15xf32> -> vector<1x16xf32>
    %100 = vector.extract_strided_slice %95 {offsets = [1, 15], sizes = [1, 2], strides = [1, 1]} : vector<8x17xf32> to vector<1x2xf32>
    %101 = vector.extract_strided_slice %95 {offsets = [2, 0], sizes = [1, 14], strides = [1, 1]} : vector<8x17xf32> to vector<1x14xf32>
    %102 = tpu.concatenate %100, %101 in 1 : vector<1x2xf32>, vector<1x14xf32> -> vector<1x16xf32>
    %103 = vector.extract_strided_slice %95 {offsets = [2, 14], sizes = [1, 3], strides = [1, 1]} : vector<8x17xf32> to vector<1x3xf32>
    %104 = vector.extract_strided_slice %95 {offsets = [3, 0], sizes = [1, 13], strides = [1, 1]} : vector<8x17xf32> to vector<1x13xf32>
    %105 = tpu.concatenate %103, %104 in 1 : vector<1x3xf32>, vector<1x13xf32> -> vector<1x16xf32>
    %106 = vector.extract_strided_slice %95 {offsets = [3, 13], sizes = [1, 4], strides = [1, 1]} : vector<8x17xf32> to vector<1x4xf32>
    %107 = vector.extract_strided_slice %95 {offsets = [4, 0], sizes = [1, 12], strides = [1, 1]} : vector<8x17xf32> to vector<1x12xf32>
    %108 = tpu.concatenate %106, %107 in 1 : vector<1x4xf32>, vector<1x12xf32> -> vector<1x16xf32>
    %109 = vector.extract_strided_slice %95 {offsets = [4, 12], sizes = [1, 5], strides = [1, 1]} : vector<8x17xf32> to vector<1x5xf32>
    %110 = vector.extract_strided_slice %95 {offsets = [5, 0], sizes = [1, 11], strides = [1, 1]} : vector<8x17xf32> to vector<1x11xf32>
    %111 = tpu.concatenate %109, %110 in 1 : vector<1x5xf32>, vector<1x11xf32> -> vector<1x16xf32>
    %112 = vector.extract_strided_slice %95 {offsets = [5, 11], sizes = [1, 6], strides = [1, 1]} : vector<8x17xf32> to vector<1x6xf32>
    %113 = vector.extract_strided_slice %95 {offsets = [6, 0], sizes = [1, 10], strides = [1, 1]} : vector<8x17xf32> to vector<1x10xf32>
    %114 = tpu.concatenate %112, %113 in 1 : vector<1x6xf32>, vector<1x10xf32> -> vector<1x16xf32>
    %115 = vector.extract_strided_slice %95 {offsets = [6, 10], sizes = [1, 7], strides = [1, 1]} : vector<8x17xf32> to vector<1x7xf32>
    %116 = vector.extract_strided_slice %95 {offsets = [7, 0], sizes = [1, 9], strides = [1, 1]} : vector<8x17xf32> to vector<1x9xf32>
    %117 = tpu.concatenate %115, %116 in 1 : vector<1x7xf32>, vector<1x9xf32> -> vector<1x16xf32>
    %118 = tpu.concatenate %96, %99, %102, %105, %108, %111, %114, %117 in 0 : vector<1x16xf32>, vector<1x16xf32>, vector<1x16xf32>, vector<1x16xf32>, vector<1x16xf32>, vector<1x16xf32>, vector<1x16xf32>, vector<1x16xf32> -> vector<8x16xf32>
    %119 = arith.addf %94, %118 : vector<8x16xf32>
    %120 = arith.addf %119, %48 : vector<8x16xf32>
    %cst_39 = arith.constant dense<0xFF800000> : vector<8xf32>
    %121 = vector.multi_reduction <maximumf>, %120, %cst_39 [1] : vector<8x16xf32> to vector<8xf32>
    %122 = vector.shape_cast %121 : vector<8xf32> to vector<8x1xf32>
    %123 = vector.broadcast %122 : vector<8x1xf32> to vector<8x16xf32>
    %124 = arith.subf %120, %123 : vector<8x16xf32>
    %125 = math.exp %124 : vector<8x16xf32>
    %cst_40 = arith.constant dense<0.000000e+00> : vector<8xf32>
    %126 = vector.multi_reduction <add>, %125, %cst_40 [1] : vector<8x16xf32> to vector<8xf32>
    %127 = vector.shape_cast %126 : vector<8xf32> to vector<8x1xf32>
    %128 = tpu.reciprocal %127 {approx = true} : vector<8x1xf32> -> vector<8x1xf32>
    %129 = vector.broadcast %128 : vector<8x1xf32> to vector<8x16xf32>
    %130 = arith.mulf %125, %129 : vector<8x16xf32>
    %cst_41 = arith.constant dense<0.000000e+00> : vector<8x8xf32>
    %131 = tpu.matmul %130, %93, %cst_41 {dimension_numbers = #tpu.dot_dimension_numbers<[1], [0], [0], [1], [0, 0, 1, 1], [], []>} : vector<8x16xf32>, vector<16x8xf32>, vector<8x8xf32> -> vector<8x8xf32>
    %c0_42 = arith.constant 0 : index
    %c8 = arith.constant 8 : index
    %132 = vector.load %arg21[%c0_42, %c8] : memref<8x32xf32, #tpu.memory_space<vmem>>, vector<8x8xf32>
    tpu.vector_store %arg21[%c0_42, %c8], %131 {strides = array<i32>} : memref<8x32xf32, #tpu.memory_space<vmem>>, vector<8x8xf32>,
    %133 = vector.extract_strided_slice %41 {offsets = [0, 16], sizes = [8, 8], strides = [1, 1]} : vector<8x32xf32> to vector<8x8xf32>
    %134 = vector.extract_strided_slice %27 {offsets = [0, 16], sizes = [16, 8], strides = [1, 1]} : vector<16x32xf32> to vector<16x8xf32>
    %135 = vector.extract_strided_slice %32 {offsets = [0, 16], sizes = [16, 8], strides = [1, 1]} : vector<16x32xf32> to vector<16x8xf32>
    %cst_43 = arith.constant dense<0.000000e+00> : vector<8x16xf32>
    %136 = tpu.matmul %133, %134, %cst_43 {dimension_numbers = #tpu.dot_dimension_numbers<[1], [1], [0], [0], [0, 0, 1, 0], [], []>} : vector<8x8xf32>, vector<16x8xf32>, vector<8x16xf32> -> vector<8x16xf32>
    %137 = vector.extract_strided_slice %46 {offsets = [0, 34], sizes = [8, 17], strides = [1, 1]} : vector<8x68xf32> to vector<8x17xf32>
    %138 = vector.extract_strided_slice %137 {offsets = [0, 0], sizes = [1, 16], strides = [1, 1]} : vector<8x17xf32> to vector<1x16xf32>
    %139 = vector.extract_strided_slice %137 {offsets = [0, 16], sizes = [1, 1], strides = [1, 1]} : vector<8x17xf32> to vector<1x1xf32>
    %140 = vector.extract_strided_slice %137 {offsets = [1, 0], sizes = [1, 15], strides = [1, 1]} : vector<8x17xf32> to vector<1x15xf32>
    %141 = tpu.concatenate %139, %140 in 1 : vector<1x1xf32>, vector<1x15xf32> -> vector<1x16xf32>
    %142 = vector.extract_strided_slice %137 {offsets = [1, 15], sizes = [1, 2], strides = [1, 1]} : vector<8x17xf32> to vector<1x2xf32>
    %143 = vector.extract_strided_slice %137 {offsets = [2, 0], sizes = [1, 14], strides = [1, 1]} : vector<8x17xf32> to vector<1x14xf32>
    %144 = tpu.concatenate %142, %143 in 1 : vector<1x2xf32>, vector<1x14xf32> -> vector<1x16xf32>
    %145 = vector.extract_strided_slice %137 {offsets = [2, 14], sizes = [1, 3], strides = [1, 1]} : vector<8x17xf32> to vector<1x3xf32>
    %146 = vector.extract_strided_slice %137 {offsets = [3, 0], sizes = [1, 13], strides = [1, 1]} : vector<8x17xf32> to vector<1x13xf32>
    %147 = tpu.concatenate %145, %146 in 1 : vector<1x3xf32>, vector<1x13xf32> -> vector<1x16xf32>
    %148 = vector.extract_strided_slice %137 {offsets = [3, 13], sizes = [1, 4], strides = [1, 1]} : vector<8x17xf32> to vector<1x4xf32>
    %149 = vector.extract_strided_slice %137 {offsets = [4, 0], sizes = [1, 12], strides = [1, 1]} : vector<8x17xf32> to vector<1x12xf32>
    %150 = tpu.concatenate %148, %149 in 1 : vector<1x4xf32>, vector<1x12xf32> -> vector<1x16xf32>
    %151 = vector.extract_strided_slice %137 {offsets = [4, 12], sizes = [1, 5], strides = [1, 1]} : vector<8x17xf32> to vector<1x5xf32>
    %152 = vector.extract_strided_slice %137 {offsets = [5, 0], sizes = [1, 11], strides = [1, 1]} : vector<8x17xf32> to vector<1x11xf32>
    %153 = tpu.concatenate %151, %152 in 1 : vector<1x5xf32>, vector<1x11xf32> -> vector<1x16xf32>
    %154 = vector.extract_strided_slice %137 {offsets = [5, 11], sizes = [1, 6], strides = [1, 1]} : vector<8x17xf32> to vector<1x6xf32>
    %155 = vector.extract_strided_slice %137 {offsets = [6, 0], sizes = [1, 10], strides = [1, 1]} : vector<8x17xf32> to vector<1x10xf32>
    %156 = tpu.concatenate %154, %155 in 1 : vector<1x6xf32>, vector<1x10xf32> -> vector<1x16xf32>
    %157 = vector.extract_strided_slice %137 {offsets = [6, 10], sizes = [1, 7], strides = [1, 1]} : vector<8x17xf32> to vector<1x7xf32>
    %158 = vector.extract_strided_slice %137 {offsets = [7, 0], sizes = [1, 9], strides = [1, 1]} : vector<8x17xf32> to vector<1x9xf32>
    %159 = tpu.concatenate %157, %158 in 1 : vector<1x7xf32>, vector<1x9xf32> -> vector<1x16xf32>
    %160 = tpu.concatenate %138, %141, %144, %147, %150, %153, %156, %159 in 0 : vector<1x16xf32>, vector<1x16xf32>, vector<1x16xf32>, vector<1x16xf32>, vector<1x16xf32>, vector<1x16xf32>, vector<1x16xf32>, vector<1x16xf32> -> vector<8x16xf32>
    %161 = arith.addf %136, %160 : vector<8x16xf32>
    %162 = arith.addf %161, %48 : vector<8x16xf32>
    %cst_44 = arith.constant dense<0xFF800000> : vector<8xf32>
    %163 = vector.multi_reduction <maximumf>, %162, %cst_44 [1] : vector<8x16xf32> to vector<8xf32>
    %164 = vector.shape_cast %163 : vector<8xf32> to vector<8x1xf32>
    %165 = vector.broadcast %164 : vector<8x1xf32> to vector<8x16xf32>
    %166 = arith.subf %162, %165 : vector<8x16xf32>
    %167 = math.exp %166 : vector<8x16xf32>
    %cst_45 = arith.constant dense<0.000000e+00> : vector<8xf32>
    %168 = vector.multi_reduction <add>, %167, %cst_45 [1] : vector<8x16xf32> to vector<8xf32>
    %169 = vector.shape_cast %168 : vector<8xf32> to vector<8x1xf32>
    %170 = tpu.reciprocal %169 {approx = true} : vector<8x1xf32> -> vector<8x1xf32>
    %171 = vector.broadcast %170 : vector<8x1xf32> to vector<8x16xf32>
    %172 = arith.mulf %167, %171 : vector<8x16xf32>
    %cst_46 = arith.constant dense<0.000000e+00> : vector<8x8xf32>
    %173 = tpu.matmul %172, %135, %cst_46 {dimension_numbers = #tpu.dot_dimension_numbers<[1], [0], [0], [1], [0, 0, 1, 1], [], []>} : vector<8x16xf32>, vector<16x8xf32>, vector<8x8xf32> -> vector<8x8xf32>
    %c0_47 = arith.constant 0 : index
    %c16 = arith.constant 16 : index
    %174 = vector.load %arg21[%c0_47, %c16] : memref<8x32xf32, #tpu.memory_space<vmem>>, vector<8x8xf32>
    tpu.vector_store %arg21[%c0_47, %c16], %173 {strides = array<i32>} : memref<8x32xf32, #tpu.memory_space<vmem>>, vector<8x8xf32>,
    %175 = vector.extract_strided_slice %41 {offsets = [0, 24], sizes = [8, 8], strides = [1, 1]} : vector<8x32xf32> to vector<8x8xf32>
    %176 = vector.extract_strided_slice %27 {offsets = [0, 24], sizes = [16, 8], strides = [1, 1]} : vector<16x32xf32> to vector<16x8xf32>
    %177 = vector.extract_strided_slice %32 {offsets = [0, 24], sizes = [16, 8], strides = [1, 1]} : vector<16x32xf32> to vector<16x8xf32>
    %cst_48 = arith.constant dense<0.000000e+00> : vector<8x16xf32>
    %178 = tpu.matmul %175, %176, %cst_48 {dimension_numbers = #tpu.dot_dimension_numbers<[1], [1], [0], [0], [0, 0, 1, 0], [], []>} : vector<8x8xf32>, vector<16x8xf32>, vector<8x16xf32> -> vector<8x16xf32>
    %179 = vector.extract_strided_slice %46 {offsets = [0, 51], sizes = [8, 17], strides = [1, 1]} : vector<8x68xf32> to vector<8x17xf32>
    %180 = vector.extract_strided_slice %179 {offsets = [0, 0], sizes = [1, 16], strides = [1, 1]} : vector<8x17xf32> to vector<1x16xf32>
    %181 = vector.extract_strided_slice %179 {offsets = [0, 16], sizes = [1, 1], strides = [1, 1]} : vector<8x17xf32> to vector<1x1xf32>
    %182 = vector.extract_strided_slice %179 {offsets = [1, 0], sizes = [1, 15], strides = [1, 1]} : vector<8x17xf32> to vector<1x15xf32>
    %183 = tpu.concatenate %181, %182 in 1 : vector<1x1xf32>, vector<1x15xf32> -> vector<1x16xf32>
    %184 = vector.extract_strided_slice %179 {offsets = [1, 15], sizes = [1, 2], strides = [1, 1]} : vector<8x17xf32> to vector<1x2xf32>
    %185 = vector.extract_strided_slice %179 {offsets = [2, 0], sizes = [1, 14], strides = [1, 1]} : vector<8x17xf32> to vector<1x14xf32>
    %186 = tpu.concatenate %184, %185 in 1 : vector<1x2xf32>, vector<1x14xf32> -> vector<1x16xf32>
    %187 = vector.extract_strided_slice %179 {offsets = [2, 14], sizes = [1, 3], strides = [1, 1]} : vector<8x17xf32> to vector<1x3xf32>
    %188 = vector.extract_strided_slice %179 {offsets = [3, 0], sizes = [1, 13], strides = [1, 1]} : vector<8x17xf32> to vector<1x13xf32>
    %189 = tpu.concatenate %187, %188 in 1 : vector<1x3xf32>, vector<1x13xf32> -> vector<1x16xf32>
    %190 = vector.extract_strided_slice %179 {offsets = [3, 13], sizes = [1, 4], strides = [1, 1]} : vector<8x17xf32> to vector<1x4xf32>
    %191 = vector.extract_strided_slice %179 {offsets = [4, 0], sizes = [1, 12], strides = [1, 1]} : vector<8x17xf32> to vector<1x12xf32>
    %192 = tpu.concatenate %190, %191 in 1 : vector<1x4xf32>, vector<1x12xf32> -> vector<1x16xf32>
    %193 = vector.extract_strided_slice %179 {offsets = [4, 12], sizes = [1, 5], strides = [1, 1]} : vector<8x17xf32> to vector<1x5xf32>
    %194 = vector.extract_strided_slice %179 {offsets = [5, 0], sizes = [1, 11], strides = [1, 1]} : vector<8x17xf32> to vector<1x11xf32>
    %195 = tpu.concatenate %193, %194 in 1 : vector<1x5xf32>, vector<1x11xf32> -> vector<1x16xf32>
    %196 = vector.extract_strided_slice %179 {offsets = [5, 11], sizes = [1, 6], strides = [1, 1]} : vector<8x17xf32> to vector<1x6xf32>
    %197 = vector.extract_strided_slice %179 {offsets = [6, 0], sizes = [1, 10], strides = [1, 1]} : vector<8x17xf32> to vector<1x10xf32>
    %198 = tpu.concatenate %196, %197 in 1 : vector<1x6xf32>, vector<1x10xf32> -> vector<1x16xf32>
    %199 = vector.extract_strided_slice %179 {offsets = [6, 10], sizes = [1, 7], strides = [1, 1]} : vector<8x17xf32> to vector<1x7xf32>
    %200 = vector.extract_strided_slice %179 {offsets = [7, 0], sizes = [1, 9], strides = [1, 1]} : vector<8x17xf32> to vector<1x9xf32>
    %201 = tpu.concatenate %199, %200 in 1 : vector<1x7xf32>, vector<1x9xf32> -> vector<1x16xf32>
    %202 = tpu.concatenate %180, %183, %186, %189, %192, %195, %198, %201 in 0 : vector<1x16xf32>, vector<1x16xf32>, vector<1x16xf32>, vector<1x16xf32>, vector<1x16xf32>, vector<1x16xf32>, vector<1x16xf32>, vector<1x16xf32> -> vector<8x16xf32>
    %203 = arith.addf %178, %202 : vector<8x16xf32>
    %204 = arith.addf %203, %48 : vector<8x16xf32>
    %cst_49 = arith.constant dense<0xFF800000> : vector<8xf32>
    %205 = vector.multi_reduction <maximumf>, %204, %cst_49 [1] : vector<8x16xf32> to vector<8xf32>
    %206 = vector.shape_cast %205 : vector<8xf32> to vector<8x1xf32>
    %207 = vector.broadcast %206 : vector<8x1xf32> to vector<8x16xf32>
    %208 = arith.subf %204, %207 : vector<8x16xf32>
    %209 = math.exp %208 : vector<8x16xf32>
    %cst_50 = arith.constant dense<0.000000e+00> : vector<8xf32>
    %210 = vector.multi_reduction <add>, %209, %cst_50 [1] : vector<8x16xf32> to vector<8xf32>
    %211 = vector.shape_cast %210 : vector<8xf32> to vector<8x1xf32>
    %212 = tpu.reciprocal %211 {approx = true} : vector<8x1xf32> -> vector<8x1xf32>
    %213 = vector.broadcast %212 : vector<8x1xf32> to vector<8x16xf32>
    %214 = arith.mulf %209, %213 : vector<8x16xf32>
    %cst_51 = arith.constant dense<0.000000e+00> : vector<8x8xf32>
    %215 = tpu.matmul %214, %177, %cst_51 {dimension_numbers = #tpu.dot_dimension_numbers<[1], [0], [0], [1], [0, 0, 1, 1], [], []>} : vector<8x16xf32>, vector<16x8xf32>, vector<8x8xf32> -> vector<8x8xf32>
    %c0_52 = arith.constant 0 : index
    %c24 = arith.constant 24 : index
    %216 = vector.load %arg21[%c0_52, %c24] : memref<8x32xf32, #tpu.memory_space<vmem>>, vector<8x8xf32>
    tpu.vector_store %arg21[%c0_52, %c24], %215 {strides = array<i32>} : memref<8x32xf32, #tpu.memory_space<vmem>>, vector<8x8xf32>,
    %c0_53 = arith.constant 0 : index
    %c0_54 = arith.constant 0 : index
    %217 = vector.load %arg21[%c0_53, %c0_54] : memref<8x32xf32, #tpu.memory_space<vmem>>, vector<8x32xf32>
    %c0_55 = arith.constant 0 : index
    %c0_56 = arith.constant 0 : index
    %218 = vector.load %arg12[%c0_55, %c0_56] : memref<32x32xf32, #tpu.memory_space<vmem>>, vector<32x32xf32>
    %cst_57 = arith.constant dense<0.000000e+00> : vector<8x32xf32>
    %219 = tpu.matmul %217, %218, %cst_57 {dimension_numbers = #tpu.dot_dimension_numbers<[1], [0], [0], [1], [0, 0, 1, 1], [], []>} : vector<8x32xf32>, vector<32x32xf32>, vector<8x32xf32> -> vector<8x32xf32>
    %c0_58 = arith.constant 0 : index
    %c0_59 = arith.constant 0 : index
    %220 = vector.load %arg13[%c0_58, %c0_59] : memref<1x32xf32, #tpu.memory_space<vmem>>, vector<1x32xf32>
    %221 = vector.broadcast %220 : vector<1x32xf32> to vector<8x32xf32>
    %222 = arith.addf %219, %221 : vector<8x32xf32>
    %223 = arith.addf %34, %222 : vector<8x32xf32>
    %c0_60 = arith.constant 0 : index
    %c0_61 = arith.constant 0 : index
    %224 = vector.load %arg14[%c0_60, %c0_61] : memref<1x32xf32, #tpu.memory_space<vmem>>, vector<1x32xf32>
    %c0_62 = arith.constant 0 : index
    %c0_63 = arith.constant 0 : index
    %225 = vector.load %arg15[%c0_62, %c0_63] : memref<1x32xf32, #tpu.memory_space<vmem>>, vector<1x32xf32>
    %cst_64 = arith.constant dense<0.000000e+00> : vector<8xf32>
    %226 = vector.multi_reduction <add>, %223, %cst_64 [1] : vector<8x32xf32> to vector<8xf32>
    %227 = vector.shape_cast %226 : vector<8xf32> to vector<8x1xf32>
    %cst_65 = arith.constant 3.200000e+01 : f32
    %228 = vector.broadcast %cst_65 : f32 to vector<8x1xf32>
    %229 = arith.divf %227, %228 : vector<8x1xf32>
    %230 = vector.broadcast %229 : vector<8x1xf32> to vector<8x32xf32>
    %231 = arith.subf %223, %230 : vector<8x32xf32>
    %232 = arith.mulf %231, %231 : vector<8x32xf32>
    %cst_66 = arith.constant dense<0.000000e+00> : vector<8xf32>
    %233 = vector.multi_reduction <add>, %232, %cst_66 [1] : vector<8x32xf32> to vector<8xf32>
    %234 = vector.shape_cast %233 : vector<8xf32> to vector<8x1xf32>
    %cst_67 = arith.constant 3.200000e+01 : f32
    %235 = vector.broadcast %cst_67 : f32 to vector<8x1xf32>
    %236 = arith.divf %234, %235 : vector<8x1xf32>
    %237 = vector.broadcast %229 : vector<8x1xf32> to vector<8x32xf32>
    %238 = arith.subf %223, %237 : vector<8x32xf32>
    %cst_68 = arith.constant 9.99999974E-6 : f32
    %239 = vector.broadcast %cst_68 : f32 to vector<8x1xf32>
    %240 = arith.addf %236, %239 : vector<8x1xf32>
    %241 = math.rsqrt %240 : vector<8x1xf32>
    %242 = vector.broadcast %241 : vector<8x1xf32> to vector<8x32xf32>
    %243 = arith.mulf %238, %242 : vector<8x32xf32>
    %244 = vector.broadcast %224 : vector<1x32xf32> to vector<8x32xf32>
    %245 = arith.mulf %243, %244 : vector<8x32xf32>
    %246 = vector.broadcast %225 : vector<1x32xf32> to vector<8x32xf32>
    %247 = arith.addf %245, %246 : vector<8x32xf32>
    %c0_69 = arith.constant 0 : index
    %c0_70 = arith.constant 0 : index
    %248 = vector.load %arg16[%c0_69, %c0_70] : memref<32x64xf32, #tpu.memory_space<vmem>>, vector<32x64xf32>
    %cst_71 = arith.constant dense<0.000000e+00> : vector<8x64xf32>
    %249 = tpu.matmul %247, %248, %cst_71 {dimension_numbers = #tpu.dot_dimension_numbers<[1], [0], [0], [1], [0, 0, 1, 1], [], []>} : vector<8x32xf32>, vector<32x64xf32>, vector<8x64xf32> -> vector<8x64xf32>
    %c0_72 = arith.constant 0 : index
    %c0_73 = arith.constant 0 : index
    %250 = vector.load %arg17[%c0_72, %c0_73] : memref<1x64xf32, #tpu.memory_space<vmem>>, vector<1x64xf32>
    %251 = vector.broadcast %250 : vector<1x64xf32> to vector<8x64xf32>
    %252 = arith.addf %249, %251 : vector<8x64xf32>
    %cst_74 = arith.constant 0.000000e+00 : f32
    %253 = vector.broadcast %cst_74 : f32 to vector<8x64xf32>
    %254 = arith.maximumf %252, %253 : vector<8x64xf32>
    %c0_75 = arith.constant 0 : index
    %c0_76 = arith.constant 0 : index
    %255 = vector.load %arg18[%c0_75, %c0_76] : memref<64x32xf32, #tpu.memory_space<vmem>>, vector<64x32xf32>
    %cst_77 = arith.constant dense<0.000000e+00> : vector<8x32xf32>
    %256 = tpu.matmul %254, %255, %cst_77 {dimension_numbers = #tpu.dot_dimension_numbers<[1], [0], [0], [1], [0, 0, 1, 1], [], []>} : vector<8x64xf32>, vector<64x32xf32>, vector<8x32xf32> -> vector<8x32xf32>
    %c0_78 = arith.constant 0 : index
    %c0_79 = arith.constant 0 : index
    %257 = vector.load %arg19[%c0_78, %c0_79] : memref<1x32xf32, #tpu.memory_space<vmem>>, vector<1x32xf32>
    %258 = vector.broadcast %257 : vector<1x32xf32> to vector<8x32xf32>
    %259 = arith.addf %256, %258 : vector<8x32xf32>
    %260 = arith.addf %223, %259 : vector<8x32xf32>
    %261 = vector.shape_cast %260 : vector<8x32xf32> to vector<1x8x32xf32>
    %c0_80 = arith.constant 0 : index
    %c0_81 = arith.constant 0 : index
    %c0_82 = arith.constant 0 : index
    %262 = vector.load %arg20[%c0_80, %c0_81, %c0_82] : memref<1x8x32xf32, #tpu.memory_space<vmem>>, vector<1x8x32xf32>
    tpu.vector_store %arg20[%c0_80, %c0_81, %c0_82], %261 {strides = array<i32>} : memref<1x8x32xf32, #tpu.memory_space<vmem>>, vector<1x8x32xf32>,
    return
  }
  func.func @transform_0(%arg0: i32) -> (i32, i32, i32) {
    %c0_i32 = arith.constant 0 : i32
    %c0_i32_0 = arith.constant 0 : i32
    %c0_i32_1 = arith.constant 0 : i32
    return %arg0, %c0_i32, %c0_i32_0 : i32, i32, i32
  }
  func.func @transform_1(%arg0: i32) -> (i32, i32, i32) {
    %c0_i32 = arith.constant 0 : i32
    %c0_i32_0 = arith.constant 0 : i32
    %c0_i32_1 = arith.constant 0 : i32
    return %arg0, %c0_i32, %c0_i32_0 : i32, i32, i32
  }
  func.func @transform_2(%arg0: i32) -> (i32, i32) {
    %c0_i32 = arith.constant 0 : i32
    %c0_i32_0 = arith.constant 0 : i32
    %c0_i32_1 = arith.constant 0 : i32
    return %c0_i32, %c0_i32_0 : i32, i32
  }
  func.func @transform_3(%arg0: i32) -> (i32, i32) {
    %c0_i32 = arith.constant 0 : i32
    %c0_i32_0 = arith.constant 0 : i32
    %c0_i32_1 = arith.constant 0 : i32
    return %c0_i32, %c0_i32_0 : i32, i32
  }
  func.func @transform_4(%arg0: i32) -> (i32, i32) {
    %c0_i32 = arith.constant 0 : i32
    %c0_i32_0 = arith.constant 0 : i32
    %c0_i32_1 = arith.constant 0 : i32
    return %c0_i32, %c0_i32_0 : i32, i32
  }
  func.func @transform_5(%arg0: i32) -> (i32, i32) {
    %c0_i32 = arith.constant 0 : i32
    %c0_i32_0 = arith.constant 0 : i32
    %c0_i32_1 = arith.constant 0 : i32
    return %c0_i32, %c0_i32_0 : i32, i32
  }
  func.func @transform_6(%arg0: i32) -> (i32, i32) {
    %c0_i32 = arith.constant 0 : i32
    %c0_i32_0 = arith.constant 0 : i32
    %c0_i32_1 = arith.constant 0 : i32
    return %c0_i32, %c0_i32_0 : i32, i32
  }
  func.func @transform_7(%arg0: i32) -> (i32, i32) {
    %c0_i32 = arith.constant 0 : i32
    %c0_i32_0 = arith.constant 0 : i32
    %c0_i32_1 = arith.constant 0 : i32
    return %c0_i32, %c0_i32_0 : i32, i32
  }
  func.func @transform_8(%arg0: i32) -> (i32, i32) {
    %c0_i32 = arith.constant 0 : i32
    %c0_i32_0 = arith.constant 0 : i32
    %c0_i32_1 = arith.constant 0 : i32
    return %c0_i32, %c0_i32_0 : i32, i32
  }
  func.func @transform_9(%arg0: i32) -> (i32, i32) {
    %c0_i32 = arith.constant 0 : i32
    %c0_i32_0 = arith.constant 0 : i32
    %c0_i32_1 = arith.constant 0 : i32
    return %c0_i32, %c0_i32_0 : i32, i32
  }
  func.func @transform_10(%arg0: i32) -> (i32, i32) {
    %c0_i32 = arith.constant 0 : i32
    %c0_i32_0 = arith.constant 0 : i32
    %c0_i32_1 = arith.constant 0 : i32
    return %c0_i32, %c0_i32_0 : i32, i32
  }
  func.func @transform_11(%arg0: i32) -> (i32, i32) {
    %c0_i32 = arith.constant 0 : i32
    %c0_i32_0 = arith.constant 0 : i32
    %c0_i32_1 = arith.constant 0 : i32
    return %c0_i32, %c0_i32_0 : i32, i32
  }
  func.func @transform_12(%arg0: i32) -> (i32, i32) {
    %c0_i32 = arith.constant 0 : i32
    %c0_i32_0 = arith.constant 0 : i32
    %c0_i32_1 = arith.constant 0 : i32
    return %c0_i32, %c0_i32_0 : i32, i32
  }
  func.func @transform_13(%arg0: i32) -> (i32, i32) {
    %c0_i32 = arith.constant 0 : i32
    %c0_i32_0 = arith.constant 0 : i32
    %c0_i32_1 = arith.constant 0 : i32
    return %c0_i32, %c0_i32_0 : i32, i32
  }
  func.func @transform_14(%arg0: i32) -> (i32, i32) {
    %c0_i32 = arith.constant 0 : i32
    %c0_i32_0 = arith.constant 0 : i32
    %c0_i32_1 = arith.constant 0 : i32
    return %c0_i32, %c0_i32_0 : i32, i32
  }
  func.func @transform_15(%arg0: i32) -> (i32, i32) {
    %c0_i32 = arith.constant 0 : i32
    %c0_i32_0 = arith.constant 0 : i32
    %c0_i32_1 = arith.constant 0 : i32
    return %c0_i32, %c0_i32_0 : i32, i32
  }
  func.func @transform_16(%arg0: i32) -> (i32, i32) {
    %c0_i32 = arith.constant 0 : i32
    %c0_i32_0 = arith.constant 0 : i32
    %c0_i32_1 = arith.constant 0 : i32
    return %c0_i32, %c0_i32_0 : i32, i32
  }
  func.func @transform_17(%arg0: i32) -> (i32, i32) {
    %c0_i32 = arith.constant 0 : i32
    %c0_i32_0 = arith.constant 0 : i32
    %c0_i32_1 = arith.constant 0 : i32
    return %c0_i32, %c0_i32_0 : i32, i32
  }
  func.func @transform_18(%arg0: i32) -> (i32, i32) {
    %c0_i32 = arith.constant 0 : i32
    %c0_i32_0 = arith.constant 0 : i32
    %c0_i32_1 = arith.constant 0 : i32
    return %c0_i32, %c0_i32_0 : i32, i32
  }
  func.func @transform_19(%arg0: i32) -> (i32, i32, i32) {
    %c0_i32 = arith.constant 0 : i32
    %c0_i32_0 = arith.constant 0 : i32
    %c0_i32_1 = arith.constant 0 : i32
    return %arg0, %c0_i32, %c0_i32_0 : i32, i32, i32
  }
}

</mosaic_0001>

<bundles_post_ra>
// kernel: tpu_custom_call.1
= control target key start
LH: loop header
LB: loop body
LE: loop exit
PB: predicated region body
PF: predicated region fallthrough
CT: control target
= control target key end

     0   :  { %s4864_s0 = inlined_call_operand.vmem [shape: f32[2,16,32], index: 0, kind: input, shape index: {}]   ;;  %s4865_s1 = inlined_call_operand.hbm [shape: f32[2,8,16], index: 1, kind: input, shape index: {}]   ;;  %s4866_s2 = inlined_call_operand.hbm [shape: f32[1,32], index: 2, kind: input, shape index: {}]   ;;  %s4867_s3 = inlined_call_operand.hbm [shape: f32[1,32], index: 3, kind: input, shape index: {}]   ;;  %s4868_s4 = inlined_call_operand.vmem [shape: f32[32,32], index: 4, kind: input, shape index: {}]   ;;  %s4869_s5 = inlined_call_operand.vmem [shape: f32[32,32], index: 5, kind: input, shape index: {}]   ;;  %s4870_s6 = inlined_call_operand.hbm [shape: f32[32,32], index: 6, kind: input, shape index: {}]   ;;  %s4871_s7 = inlined_call_operand.hbm [shape: f32[1,32], index: 7, kind: input, shape index: {}]   ;;  %s4872_s8 = inlined_call_operand.hbm [shape: f32[1,32], index: 8, kind: input, shape index: {}]   ;;  %s4873_s9 = inlined_call_operand.vmem [shape: f32[32,68], index: 9, kind: input, shape index: {}]   ;;  %s4874_s10 = inlined_call_operand.hbm [shape: f32[1,68], index: 10, kind: input, shape index: {}]   ;;  %s4875_s11 = inlined_call_operand.hbm [shape: f32[32,32], index: 11, kind: input, shape index: {}]   ;;  %s4876_s12 = inlined_call_operand.hbm [shape: f32[1,32], index: 12, kind: input, shape index: {}]   ;;  %s4877_s13 = inlined_call_operand.hbm [shape: f32[1,32], index: 13, kind: input, shape index: {}]   ;;  %s4878_s14 = inlined_call_operand.hbm [shape: f32[1,32], index: 14, kind: input, shape index: {}]   ;;  %s4879_s15 = inlined_call_operand.hbm [shape: f32[32,64], index: 15, kind: input, shape index: {}]   ;;  %s4880_s16 = inlined_call_operand.hbm [shape: f32[1,64], index: 16, kind: input, shape index: {}]   ;;  %s4881_s17 = inlined_call_operand.vmem [shape: f32[64,32], index: 17, kind: input, shape index: {}]   ;;  %s4882_s18 = inlined_call_operand.vmem [shape: f32[1,32], index: 18, kind: input, shape index: {}]   ;;  %s4883_s19 = inlined_call_operand.hbm [shape: f32[2,8,32], index: 19, kind: output, shape index: {}]  }
   0x1   :  { %4916 = sst [smem:[#allocation33_spill]] %s4864_s0 }
   0x2   :  { %4917 = sst [smem:[#allocation34_spill]] %s4865_s1 }
   0x3   :  { %4918 = sst [smem:[#allocation35_spill]] %s4866_s2 }
   0x4   :  { %4919 = sst [smem:[#allocation36_spill]] %s4867_s3 }
   0x5   :  { %4920 = sst [smem:[#allocation37_spill]] %s4868_s4 }
   0x6   :  { %4921 = sst [smem:[#allocation38_spill]] %s4869_s5 }
   0x7   :  { %4922 = sst [smem:[#allocation39_spill]] %s4870_s6 }
   0x8   :  { %4923 = sst [smem:[#allocation40_spill]] %s4871_s7 }
   0x9   :  { %4924 = sst [smem:[#allocation41_spill]] %s4872_s8 }
   0xa   :  { %4925 = sst [smem:[#allocation42_spill]] %s4873_s9 }
   0xb   :  { %4926 = sst [smem:[#allocation43_spill]] %s4874_s10 }
   0xc   :  { %4927 = sst [smem:[#allocation44_spill]] %s4881_s17 }
   0xd   :  { %4928 = sst [smem:[#allocation45_spill]] %s4882_s18 }
   0xe   :  { %4929 = sst [smem:[#allocation46_spill]] %s4883_s19 }
   0xf   :  { %24 = vsyncpa [#allocation4], 0 }
  0x10   :  { %26 = vsyncpa [#allocation4 + $0x1], 0 }
  0x11   :  { %27 = vsyncpa [#allocation7], 0 }
  0x12   :  { %28 = vsyncpa [#allocation10], 0 }
  0x13   :  { %29 = vsyncpa [#allocation13], 0 }
  0x14   :  { %30 = vsyncpa [#allocation16], 0 }
  0x15   :  { %31 = vsyncpa [#allocation19], 0 }
  0x16   :  { %32 = vsyncpa [#allocation22], 0 }
  0x17   :  { %33 = vsyncpa [#allocation5], 0 }
  0x18   :  { %35 = vsyncpa [#allocation5 + $0x1], 0  ;;  %s4020_s0 = smov 0   ;;  %s4022_s30 = smov 0  }
  0x19   :  { %s4024_s20 = smov 0   ;;  %s4026_s21 = smov 0  }
  0x1a LB: > { %s3855_s1 = smov [#allocation6]   ;;  %s4041_s2 = sadd.s32 4294967295, %s3853_s21   ;;  %s3853_s21 = sphi %s4026_s21, %s4999_s21   ;;  %s3849_s20 = sphi %s4024_s20, %s4998_s20   ;;  %s3845_s30 = sphi %s4022_s30, %s4997_s30   ;;  %s3841_s0 = sphi %s4020_s0, %s4996_s0  }
  0x1b   : > { %s494_s22 = sshll.u32 %s3855_s1, 4  ;;  %p2767_p0 = scmp.ge.s32.totalorder %s3853_s21, 1  ;;  %s4046_s22 = int_to_ptr.vmem [resolvable:$true] %s494_s22 }
  0x1c   : > { %p4897_p1 = scmp.eq.s32.totalorder %s4041_s2, 0  ;;  %p481_p2 = scmp.lt.s32.totalorder %s3853_s21, 3 }
  0x1d   : > { %s3856_s24 = smov [#allocation9]   ;;  %s3857_s26 = smov [#allocation12]  }
  0x1e   : > { %p4048_p3 = pnand %p2767_p0, %p481_p2  ;;  %s521_s25 = sshll.u32 %s3856_s24, 4  ;;  %s4055_s25 = int_to_ptr.vmem [resolvable:$true] %s521_s25 }
  0x1f   : > { %s546_s27 = sshll.u32 %s3857_s26, 4  ;;  %s4932_s1 = sld [smem:[#allocation35_spill]]  ;;  %s4063_s27 = int_to_ptr.vmem [resolvable:$true] %s546_s27 }
  0x20   : > { %s4930_s23 = scalar_select %p4048_p3, 1, 0 }
  0x21   : > { %p3178_p5 = pneg %p4048_p3 }
  0x23   : > { %p4059_p6 = pnand %p3178_p5, %p4897_p1 }
  0x25   : > { %s3397_s19 = scalar_lea.hbm %s4932_s1, 16  ;;  %p4073_p8 = pneg %p4059_p6 }
  0x26   : > { %p3398_p7 = scmp.ne.s32.totalorder %s4932_s1, %s3397_s19  ;;  %p3404_p11 = scmp.lt.u32.totalorder %s3397_s19, %s4932_s1 }
  0x28   : > { %p3400_p9 = pnand %p4073_p8, %p3398_p7 }
  0x2a   : > { %p3401_p10 = pneg %p3400_p9 }
  0x2c   : > { %p3406_p12 = pnand %p3404_p11, %p3401_p10 }
  0x2e   : > { %3409 = shalt.err (!%p3406_p12)
}
  0x2f   : > { %s3410_s17 = scalar_lea.vmem %s4046_s22, 16  ;;  %s3417_s18 = scalar_lea.vmem %s4046_s22, 32 }
  0x30   : > { %p3411_p13 = scmp.ne.s32.totalorder %s4046_s22, %s3410_s17  ;;  %p3418_p5 = scmp.lt.s32.totalorder %s4046_s22, %s4046_s22 }
  0x31   : > { %p3419_p7 = scmp.lt.s32.totalorder %s3417_s18, %s3410_s17 }
  0x32   : > { %p3413_p0 = pnand %p3411_p13, %p4073_p8 }
  0x33   : > { %p3420_p9 = por %p3419_p7, %p3418_p5 }
  0x34   : > { %p3414_p2 = pneg %p3413_p0 }
  0x36   : > { %p3421_p4 = pnand %p3420_p9, %p3414_p2 }
  0x38   : > { %3424 = shalt.err (!%p3421_p4)
}
  0x39   : > { %3181 = dma.hbm_to_vmem [thread:$0]  (!%p4059_p6), %s4932_s1, 16, %s4046_s22, [#allocation7]  }
  0x3a   : > { %s4934_s6 = sld [smem:[#allocation39_spill]] }
  0x40   : > { %s3425_s26 = scalar_lea.hbm %s4934_s6, 512 }
  0x41   : > { %p3426_p10 = scmp.ne.s32.totalorder %s4934_s6, %s3425_s26  ;;  %p3432_p4 = scmp.lt.u32.totalorder %s3425_s26, %s4934_s6 }
  0x43   : > { %p3428_p11 = pnand %p3426_p10, %p4073_p8 }
  0x45   : > { %p3429_p12 = pneg %p3428_p11 }
  0x47   : > { %p3434_p13 = pnand %p3432_p4, %p3429_p12 }
  0x49   : > { %3437 = shalt.err (!%p3434_p13)
}
  0x4a   : > { %s3438_s22 = scalar_lea.vmem %s4055_s25, 512  ;;  %p3446_p7 = scmp.lt.s32.totalorder %s4055_s25, %s4055_s25 }
  0x4b   : > { %p3439_p0 = scmp.ne.s32.totalorder %s4055_s25, %s3438_s22  ;;  %p3447_p9 = scmp.lt.s32.totalorder %s3438_s22, %s3438_s22 }
  0x4d   : > { %p3441_p2 = pnand %p3439_p0, %p4073_p8  ;;  %p3448_p10 = por %p3447_p9, %p3446_p7 }
  0x4f   : > { %p3442_p5 = pneg %p3441_p2 }
  0x51   : > { %p3449_p11 = pnand %p3448_p10, %p3442_p5 }
  0x53   : > { %3452 = shalt.err (!%p3449_p11)
}
  0x54   : > { %s4893_s4 = smov 128   ;;  %s4895_s5 = smov 8  }
  0x55   : > { %3187 = dma.hbm_to_vmem [thread:$0]  (!%p4059_p6), %s4934_s6, 512, %s4055_s25, [#allocation10], %s4893_s4, %s4893_s4, %s4895_s5  }
  0x56   : > { %s4935_s8 = sld [smem:[#allocation41_spill]] }
  0x5c   : > { %s3453_s26 = scalar_lea.hbm %s4935_s8, 16 }
  0x5d   : > { %p3454_p12 = scmp.ne.s32.totalorder %s4935_s8, %s3453_s26  ;;  %p3460_p0 = scmp.lt.u32.totalorder %s3453_s26, %s4935_s8 }
  0x5f   : > { %p3456_p4 = pnand %p3454_p12, %p4073_p8 }
  0x61   : > { %p3457_p13 = pneg %p3456_p4 }
  0x63   : > { %p3462_p2 = pnand %p3460_p0, %p3457_p13 }
  0x65   : > { %3465 = shalt.err (!%p3462_p2)
}
  0x66   : > { %s3466_s25 = scalar_lea.vmem %s4063_s27, 16  ;;  %s3473_s9 = scalar_lea.vmem %s4063_s27, 32 }
  0x67   : > { %p3467_p5 = scmp.ne.s32.totalorder %s4063_s27, %s3466_s25  ;;  %p3474_p10 = scmp.lt.s32.totalorder %s4063_s27, %s4063_s27 }
  0x68   : > { %p3475_p11 = scmp.lt.s32.totalorder %s3473_s9, %s3466_s25 }
  0x69   : > { %p3469_p7 = pnand %p3467_p5, %p4073_p8 }
  0x6a   : > { %p3476_p12 = por %p3475_p11, %p3474_p10 }
  0x6b   : > { %p3470_p9 = pneg %p3469_p7 }
  0x6d   : > { %p3477_p4 = pnand %p3476_p12, %p3470_p9 }
  0x6f   : > { %3480 = shalt.err (!%p3477_p4)
}
  0x70   : > { %3193 = dma.hbm_to_vmem [thread:$0]  (!%p4059_p6), %s4935_s8, 16, %s4063_s27, [#allocation13]  }
  0x71   : > { %s3860_s28 = smov [#allocation15]   ;;  %s3861_s26 = smov [#allocation18]  }
  0x72   : > { %s570_s29 = sshll.u32 %s3860_s28, 4  ;;  %s595_s17 = sshll.u32 %s3861_s26, 4  ;;  %s571_s29 = int_to_ptr.vmem [resolvable:$true] %s570_s29  ;;  %s596_s17 = int_to_ptr.vmem [resolvable:$true] %s595_s17 }
  0x73   : > { %s3481_s25 = scalar_lea.hbm %s4875_s11, 512 }
  0x74   : > { %p3482_p13 = scmp.ne.s32.totalorder %s4875_s11, %s3481_s25  ;;  %p3488_p5 = scmp.lt.u32.totalorder %s3481_s25, %s4875_s11 }
  0x76   : > { %p3484_p0 = pnand %p3482_p13, %p4073_p8 }
  0x78   : > { %p3485_p2 = pneg %p3484_p0 }
  0x7a   : > { %p3490_p7 = pnand %p3488_p5, %p3485_p2 }
  0x7c   : > { %3493 = shalt.err (!%p3490_p7)
}
  0x7d   : > { %s3494_s27 = scalar_lea.vmem %s571_s29, 512  ;;  %p3502_p12 = scmp.lt.s32.totalorder %s571_s29, %s571_s29 }
  0x7e   : > { %p3495_p9 = scmp.ne.s32.totalorder %s571_s29, %s3494_s27  ;;  %p3503_p4 = scmp.lt.s32.totalorder %s3494_s27, %s3494_s27 }
  0x80   : > { %p3497_p10 = pnand %p3495_p9, %p4073_p8  ;;  %p3504_p1 = por %p3503_p4, %p3502_p12 }
  0x82   : > { %p3498_p11 = pneg %p3497_p10 }
  0x84   : > { %p3505_p3 = pnand %p3504_p1, %p3498_p11 }
  0x86   : > { %3508 = shalt.err (!%p3505_p3)
}
  0x87   : > { %s4936_s4 = smov 8   ;;  %s4937_s19 = smov 128  }
  0x88   : > { %3199 = dma.hbm_to_vmem [thread:$0]  (!%p4059_p6), %s4875_s11, 512, %s571_s29, [#allocation16], %s4937_s19, %s4937_s19, %s4936_s4  }
  0x89   : > { %s3509_s22 = scalar_lea.hbm %s4877_s13, 16 }
  0x8a   : > { %p3510_p1 = scmp.ne.s32.totalorder %s4877_s13, %s3509_s22  ;;  %p3516_p0 = scmp.lt.u32.totalorder %s3509_s22, %s4877_s13 }
  0x8c   : > { %p3512_p3 = pnand %p3510_p1, %p4073_p8 }
  0x8e   : > { %p3513_p13 = pneg %p3512_p3 }
  0x90   : > { %p3518_p2 = pnand %p3516_p0, %p3513_p13 }
  0x92   : > { %3521 = shalt.err (!%p3518_p2)
}
  0x93   : > { %s3522_s5 = scalar_lea.vmem %s596_s17, 16  ;;  %s3529_s29 = scalar_lea.vmem %s596_s17, 32 }
  0x94   : > { %p3523_p5 = scmp.ne.s32.totalorder %s596_s17, %s3522_s5  ;;  %p3530_p10 = scmp.lt.s32.totalorder %s596_s17, %s596_s17 }
  0x95   : > { %p3531_p11 = scmp.lt.s32.totalorder %s3529_s29, %s3522_s5 }
  0x96   : > { %p3525_p7 = pnand %p3523_p5, %p4073_p8 }
  0x97   : > { %p3532_p12 = por %p3531_p11, %p3530_p10 }
  0x98   : > { %p3526_p9 = pneg %p3525_p7 }
  0x9a   : > { %p3533_p4 = pnand %p3532_p12, %p3526_p9 }
  0x9c   : > { %3536 = shalt.err (!%p3533_p4)
}
  0x9d   : > { %3205 = dma.hbm_to_vmem [thread:$0]  (!%p4059_p6), %s4877_s13, 16, %s596_s17, [#allocation19]  }
  0x9e   : > { %s3862_s18 = smov [#allocation21]   ;;  %s3863_s25 = smov [#allocation8]  }
  0x9f   : > { %s616_s22 = sshll.u32 %s3862_s18, 4  ;;  %s505_s9 = sshll.u32 %s3863_s25, 4  ;;  %s617_s22 = int_to_ptr.vmem [resolvable:$true] %s616_s22  ;;  %s506_s9 = int_to_ptr.vmem [resolvable:$true] %s505_s9 }
  0xa0   : > { %s3537_s6 = scalar_lea.hbm %s4879_s15, 512 }
  0xa1   : > { %p3538_p1 = scmp.ne.s32.totalorder %s4879_s15, %s3537_s6  ;;  %p3544_p0 = scmp.lt.u32.totalorder %s3537_s6, %s4879_s15 }
  0xa3   : > { %p3540_p3 = pnand %p3538_p1, %p4073_p8 }
  0xa5   : > { %p3541_p13 = pneg %p3540_p3 }
  0xa7   : > { %p3546_p2 = pnand %p3544_p0, %p3541_p13 }
  0xa9   : > { %3549 = shalt.err (!%p3546_p2)
}
  0xaa   : > { %s3550_s17 = scalar_lea.vmem %s617_s22, 512  ;;  %p3558_p10 = scmp.lt.s32.totalorder %s617_s22, %s617_s22 }
  0xab   : > { %p3551_p5 = scmp.ne.s32.totalorder %s617_s22, %s3550_s17  ;;  %p3559_p11 = scmp.lt.s32.totalorder %s3550_s17, %s3550_s17 }
  0xad   : > { %p3553_p7 = pnand %p3551_p5, %p4073_p8  ;;  %p3560_p12 = por %p3559_p11, %p3558_p10 }
  0xaf   : > { %p3554_p9 = pneg %p3553_p7 }
  0xb1   : > { %p3561_p4 = pnand %p3560_p12, %p3554_p9 }
  0xb3   : > { %3564 = shalt.err (!%p3561_p4)
}
  0xb4   : > { %3211 = dma.hbm_to_vmem [thread:$0]  (!%p4059_p6), %s4879_s15, 512, %s617_s22, [#allocation22], %s4937_s19, %s4937_s19, %s4936_s4  }
  0xb5   : > { %s4938_s25 = sld [smem:[#allocation36_spill]] }
  0xbb   : > { %s3565_s1 = scalar_lea.hbm %s4938_s25, 16 }
  0xbc   : > { %p3566_p1 = scmp.ne.s32.totalorder %s4938_s25, %s3565_s1  ;;  %p3572_p0 = scmp.lt.u32.totalorder %s3565_s1, %s4938_s25 }
  0xbe   : > { %p3568_p3 = pnand %p3566_p1, %p4073_p8 }
  0xc0   : > { %p3569_p13 = pneg %p3568_p3 }
  0xc2   : > { %p3574_p2 = pnand %p3572_p0, %p3569_p13 }
  0xc4   : > { %3577 = shalt.err (!%p3574_p2)
}
  0xc5   : > { %s3578_s17 = scalar_lea.vmem %s506_s9, 16  ;;  %s3585_s4 = scalar_lea.vmem %s506_s9, 32 }
  0xc6   : > { %p3579_p5 = scmp.ne.s32.totalorder %s506_s9, %s3578_s17  ;;  %p3586_p10 = scmp.lt.s32.totalorder %s506_s9, %s506_s9 }
  0xc7   : > { %p3587_p11 = scmp.lt.s32.totalorder %s3585_s4, %s3578_s17 }
  0xc8   : > { %p3581_p7 = pnand %p3579_p5, %p4073_p8 }
  0xc9   : > { %p3588_p12 = por %p3587_p11, %p3586_p10 }
  0xca   : > { %p3582_p9 = pneg %p3581_p7 }
  0xcc   : > { %p3589_p4 = pnand %p3588_p12, %p3582_p9 }
  0xce   : > { %3592 = shalt.err (!%p3589_p4)
}
  0xcf   : > { %3184 = dma.hbm_to_vmem [thread:$0]  (!%p4059_p6), %s4938_s25, 16, %s506_s9, [#allocation7]  }
  0xd0   : > { %s3864_s8 = smov [#allocation11]   ;;  %s3865_s26 = smov [#allocation14]  }
  0xd1   : > { %s535_s6 = sshll.u32 %s3864_s8, 4  ;;  %s560_s18 = sshll.u32 %s3865_s26, 4  ;;  %s536_s6 = int_to_ptr.vmem [resolvable:$true] %s535_s6  ;;  %s561_s18 = int_to_ptr.vmem [resolvable:$true] %s560_s18 }
  0xd2   : > { %s4939_s7 = sld [smem:[#allocation40_spill]] }
  0xd8   : > { %s3593_s5 = scalar_lea.hbm %s4939_s7, 16 }
  0xd9   : > { %p3594_p1 = scmp.ne.s32.totalorder %s4939_s7, %s3593_s5  ;;  %p3600_p0 = scmp.lt.u32.totalorder %s3593_s5, %s4939_s7 }
  0xdb   : > { %p3596_p3 = pnand %p3594_p1, %p4073_p8 }
  0xdd   : > { %p3597_p13 = pneg %p3596_p3 }
  0xdf   : > { %p3602_p2 = pnand %p3600_p0, %p3597_p13 }
  0xe1   : > { %3605 = shalt.err (!%p3602_p2)
}
  0xe2   : > { %s3606_s9 = scalar_lea.vmem %s536_s6, 16  ;;  %s3613_s19 = scalar_lea.vmem %s536_s6, 32 }
  0xe3   : > { %p3607_p5 = scmp.ne.s32.totalorder %s536_s6, %s3606_s9  ;;  %p3614_p10 = scmp.lt.s32.totalorder %s536_s6, %s536_s6 }
  0xe4   : > { %p3615_p11 = scmp.lt.s32.totalorder %s3613_s19, %s3606_s9 }
  0xe5   : > { %p3609_p7 = pnand %p3607_p5, %p4073_p8 }
  0xe6   : > { %p3616_p12 = por %p3615_p11, %p3614_p10 }
  0xe7   : > { %p3610_p9 = pneg %p3609_p7 }
  0xe9   : > { %p3617_p4 = pnand %p3616_p12, %p3610_p9 }
  0xeb   : > { %3620 = shalt.err (!%p3617_p4)
}
  0xec   : > { %3190 = dma.hbm_to_vmem [thread:$0]  (!%p4059_p6), %s4939_s7, 16, %s536_s6, [#allocation10]  }
  0xed   : > { %s4940_s10 = sld [smem:[#allocation43_spill]] }
  0xf3   : > { %s3621_s27 = scalar_lea.hbm %s4940_s10, 16 }
  0xf4   : > { %p3622_p1 = scmp.ne.s32.totalorder %s4940_s10, %s3621_s27  ;;  %p3628_p0 = scmp.lt.u32.totalorder %s3621_s27, %s4940_s10 }
  0xf6   : > { %p3624_p3 = pnand %p3622_p1, %p4073_p8 }
  0xf8   : > { %p3625_p13 = pneg %p3624_p3 }
  0xfa   : > { %p3630_p2 = pnand %p3628_p0, %p3625_p13 }
  0xfc   : > { %3633 = shalt.err (!%p3630_p2)
}
  0xfd   : > { %s3634_s4 = scalar_lea.vmem %s561_s18, 16  ;;  %s3641_s6 = scalar_lea.vmem %s561_s18, 32 }
  0xfe   : > { %p3635_p5 = scmp.ne.s32.totalorder %s561_s18, %s3634_s4  ;;  %p3642_p10 = scmp.lt.s32.totalorder %s561_s18, %s561_s18 }
  0xff   : > { %p3643_p11 = scmp.lt.s32.totalorder %s3641_s6, %s3634_s4 }
 0x100   : > { %p3637_p7 = pnand %p3635_p5, %p4073_p8 }
 0x101   : > { %p3644_p12 = por %p3643_p11, %p3642_p10 }
 0x102   : > { %p3638_p9 = pneg %p3637_p7 }
 0x104   : > { %p3645_p4 = pnand %p3644_p12, %p3638_p9 }
 0x106   : > { %3648 = shalt.err (!%p3645_p4)
}
 0x107   : > { %3196 = dma.hbm_to_vmem [thread:$0]  (!%p4059_p6), %s4940_s10, 16, %s561_s18, [#allocation13]  }
 0x108   : > { %s3866_s22 = smov [#allocation17]   ;;  %s3867_s26 = smov [#allocation20]  }
 0x109   : > { %s584_s8 = sshll.u32 %s3866_s22, 4  ;;  %s606_s1 = sshll.u32 %s3867_s26, 4  ;;  %s585_s8 = int_to_ptr.vmem [resolvable:$true] %s584_s8  ;;  %s607_s1 = int_to_ptr.vmem [resolvable:$true] %s606_s1 }
 0x10a   : > { %s3649_s29 = scalar_lea.hbm %s4876_s12, 16 }
 0x10b   : > { %p3650_p1 = scmp.ne.s32.totalorder %s4876_s12, %s3649_s29  ;;  %p3656_p0 = scmp.lt.u32.totalorder %s3649_s29, %s4876_s12 }
 0x10d   : > { %p3652_p3 = pnand %p3650_p1, %p4073_p8 }
 0x10f   : > { %p3653_p13 = pneg %p3652_p3 }
 0x111   : > { %p3658_p2 = pnand %p3656_p0, %p3653_p13 }
 0x113   : > { %3661 = shalt.err (!%p3658_p2)
}
 0x114   : > { %s3662_s18 = scalar_lea.vmem %s585_s8, 16  ;;  %s3669_s9 = scalar_lea.vmem %s585_s8, 32 }
 0x115   : > { %p3663_p5 = scmp.ne.s32.totalorder %s585_s8, %s3662_s18  ;;  %p3670_p10 = scmp.lt.s32.totalorder %s585_s8, %s585_s8 }
 0x116   : > { %p3671_p11 = scmp.lt.s32.totalorder %s3669_s9, %s3662_s18 }
 0x117   : > { %p3665_p7 = pnand %p3663_p5, %p4073_p8 }
 0x118   : > { %p3672_p12 = por %p3671_p11, %p3670_p10 }
 0x119   : > { %p3666_p9 = pneg %p3665_p7 }
 0x11b   : > { %p3673_p4 = pnand %p3672_p12, %p3666_p9 }
 0x11d   : > { %3676 = shalt.err (!%p3673_p4)
}
 0x11e   : > { %3202 = dma.hbm_to_vmem [thread:$0]  (!%p4059_p6), %s4876_s12, 16, %s585_s8, [#allocation16]  }
 0x11f   : > { %s3677_s5 = scalar_lea.hbm %s4878_s14, 16 }
 0x120   : > { %p3678_p1 = scmp.ne.s32.totalorder %s4878_s14, %s3677_s5  ;;  %p3684_p0 = scmp.lt.u32.totalorder %s3677_s5, %s4878_s14 }
 0x122   : > { %p3680_p3 = pnand %p3678_p1, %p4073_p8 }
 0x124   : > { %p3681_p13 = pneg %p3680_p3 }
 0x126   : > { %p3686_p2 = pnand %p3684_p0, %p3681_p13 }
 0x128   : > { %3689 = shalt.err (!%p3686_p2)
}
 0x129   : > { %s3690_s6 = scalar_lea.vmem %s607_s1, 16  ;;  %s3697_s8 = scalar_lea.vmem %s607_s1, 32 }
 0x12a   : > { %p3691_p5 = scmp.ne.s32.totalorder %s607_s1, %s3690_s6  ;;  %p3698_p10 = scmp.lt.s32.totalorder %s607_s1, %s607_s1 }
 0x12b   : > { %p3699_p11 = scmp.lt.s32.totalorder %s3697_s8, %s3690_s6 }
 0x12c   : > { %p3693_p7 = pnand %p3691_p5, %p4073_p8 }
 0x12d   : > { %p3700_p12 = por %p3699_p11, %p3698_p10 }
 0x12e   : > { %p3694_p9 = pneg %p3693_p7 }
 0x130   : > { %p3701_p4 = pnand %p3700_p12, %p3694_p9 }
 0x132   : > { %3704 = shalt.err (!%p3701_p4)
}
 0x133   : > { %3208 = dma.hbm_to_vmem [thread:$0]  (!%p4059_p6), %s4878_s14, 16, %s607_s1, [#allocation19]  }
 0x134   : > { %s3868_s19 = smov [#allocation23]   ;;  %s3705_s5 = scalar_lea.hbm %s4880_s16, 16 }
 0x135   : > { %s630_s22 = sshll.u32 %s3868_s19, 4  ;;  %p3706_p1 = scmp.ne.s32.totalorder %s4880_s16, %s3705_s5  ;;  %s631_s22 = int_to_ptr.vmem [resolvable:$true] %s630_s22 }
 0x136   : > { %p3712_p0 = scmp.lt.u32.totalorder %s3705_s5, %s4880_s16 }
 0x137   : > { %p3708_p3 = pnand %p3706_p1, %p4073_p8 }
 0x139   : > { %p3709_p13 = pneg %p3708_p3 }
 0x13b   : > { %p3714_p2 = pnand %p3712_p0, %p3709_p13 }
 0x13d   : > { %3717 = shalt.err (!%p3714_p2)
}
 0x13e   : > { %s3718_s1 = scalar_lea.vmem %s631_s22, 16  ;;  %s3725_s6 = scalar_lea.vmem %s631_s22, 32 }
 0x13f   : > { %p3719_p5 = scmp.ne.s32.totalorder %s631_s22, %s3718_s1  ;;  %p3726_p10 = scmp.lt.s32.totalorder %s631_s22, %s631_s22 }
 0x140   : > { %p3727_p11 = scmp.lt.s32.totalorder %s3725_s6, %s3718_s1 }
 0x141   : > { %p3721_p7 = pnand %p3719_p5, %p4073_p8 }
 0x142   : > { %p3728_p12 = por %p3727_p11, %p3726_p10 }
 0x143   : > { %p3722_p9 = pneg %p3721_p7 }
 0x145   : > { %p3729_p4 = pnand %p3728_p12, %p3722_p9 }
 0x147   : > { %3732 = shalt.err (!%p3729_p4)
}
 0x148   : > { %3214 = dma.hbm_to_vmem [thread:$0]  (!%p4059_p6), %s4880_s16, 16, %s631_s22, [#allocation22]  }
 0x149   : > { %s2766_s24 = sadd.s32 4294967294, %s3853_s21   ;;  %s4315_s3 = sadd.s32 1, %s3853_s21  }
 0x14a   : > { %s71_s9 = ssub.s32 %s3853_s21, %s4315_s3  ;;  %s74_s19 = sadd.s32 1, %s3849_s20 }
 0x14b   : > { %p72_p8 = scmp.eq.s32.totalorder %s71_s9, 0  ;;  %p81_p1 = scmp.ne.s32.totalorder %s3849_s20, %s3845_s30 }
 0x14c   : > { %p82_p3 = scmp.eq.s32.totalorder %s3853_s21, 0  ;;  %p87_p13 = scmp.ne.s32.totalorder %s3845_s30, %s3841_s0 }
 0x14d   : > { %s4326_s26 = scalar_select %p72_p8, %s3849_s20, %s74_s19  }
 0x14e   : > { %p4328_p0 = por %p82_p3, %p81_p1  ;;  %p4942_p2 = scmp.eq.s32.totalorder %s4041_s2, 0 }
 0x14f   : > { %p468_p5 = scmp.eq.s32.totalorder %s4041_s2, 1  ;;  %p474_p7 = scmp.eq.s32.totalorder %s2766_s24, 1 }
 0x150   : > { %p4334_p6 = por %p4942_p2, %p87_p13  ;;  %p3235_p9 = scmp.lt.s32.totalorder %s3853_s21, 2 }
 0x151   : > { %s655_s5 = sand.u32 1, %s3849_s20   ;;  %p4341_p10 = por %p468_p5, %p81_p1 }
 0x152   : > { %p4345_p11 = por %p474_p7, %p87_p13  ;;  %s2781_s17 = sshll.u32 %s655_s5, 3 }
 0x153   : > { %s4944_s29 = scalar_select %p4341_p10, 1, 0 }
 0x154   : > { %s4945_s28 = scalar_select %p4345_p11, 1, 0 }
 0x155   : > { %s2782_s4 = sshll.u32 %s3853_s21, 7  ;;  %s4946_s8 = sld [smem:[#allocation34_spill]] }
 0x156   : > { %s659_s24 = scalar_lea.vmem [#allocation3], %s2781_s17  ;;  %p4359_p12 = pnand %p3235_p9, %p4328_p0 }
 0x157   : > { %s666_s9 = sshll.u32 %s659_s24, 4  ;;  %s656_s7 = scalar_lea.sflag [#allocation4], %s655_s5  ;;  %s4355_s9 = int_to_ptr.vmem [resolvable:$true] %s666_s9 }
 0x158   : > { %p3735_p8 = pneg %p4359_p12 }
 0x15b   : > { %s4353_s18 = scalar_lea.hbm %s4946_s8, %s2782_s4  ;;  %s3738_s1 = scalar_lea.hbm %s4946_s8, 256 }
 0x15c   : > { %s3733_s10 = scalar_lea.hbm %s4353_s18, 128  ;;  %p3739_p13 = scmp.lt.u32.totalorder %s4353_s18, %s4946_s8 }
 0x15d   : > { %p3734_p4 = scmp.ne.s32.totalorder %s4353_s18, %s3733_s10  ;;  %p3740_p0 = scmp.lt.u32.totalorder %s3738_s1, %s3733_s10 }
 0x15e   : > { %p3742_p5 = scmp.lt.u32.totalorder %s3733_s10, %s4353_s18 }
 0x15f   : > { %p3736_p1 = pnand %p3735_p8, %p3734_p4  ;;  %p3741_p2 = por %p3740_p0, %p3739_p13 }
 0x161   : > { %p3737_p3 = pneg %p3736_p1  ;;  %p3743_p7 = por %p3742_p5, %p3741_p2 }
 0x163   : > { %p3744_p9 = pnand %p3743_p7, %p3737_p3 }
 0x165   : > { %3747 = shalt.err (!%p3744_p9)
}
 0x166   : > { %s3748_s5 = scalar_lea.vmem %s4355_s9, 128  ;;  %s3869_s24 = smov [#allocation3]  }
 0x167   : > { %p3749_p4 = scmp.ne.s32.totalorder %s4355_s9, %s3748_s5  ;;  %s3753_s17 = sshll.u32 %s3869_s24, 4  ;;  %s3754_s17 = int_to_ptr.vmem [resolvable:$false] %s3753_s17 }
 0x168   : > { %s3755_s4 = scalar_lea.vmem %s3754_s17, 256  ;;  %p3756_p10 = scmp.lt.s32.totalorder %s4355_s9, %s3754_s17 }
 0x169   : > { %p3751_p1 = pnand %p3749_p4, %p3735_p8  ;;  %p3757_p13 = scmp.lt.s32.totalorder %s3755_s4, %s3748_s5 }
 0x16b   : > { %p3752_p11 = pneg %p3751_p1  ;;  %p3758_p0 = por %p3757_p13, %p3756_p10 }
 0x16d   : > { %p3759_p2 = pnand %p3758_p0, %p3752_p11 }
 0x16f   : > { %3762 = shalt.err (!%p3759_p2)
}
 0x170   : > { %3218 = dma.hbm_to_vmem [thread:$0]  (!%p4359_p12), %s4353_s18, 128, %s4355_s9, %s656_s7  }
 0x171   : > { %p4948_p3 = scmp.ne.s32.totalorder %s4930_s23, 0 }
 0x172   : > { %s4391_s10 = sand.u32 (!%p4948_p3), 1, %s3845_s30  }
 0x173   : > { %675 = sbr.rel (%p4948_p3) target bundleno = 4636 (0x121c), region = 96  ;;  %s4900_s1 = sshll.u32 (!%p4948_p3), %s4391_s10, 3 }
 0x174   : > { %s678_s27 = scalar_lea.sflag (!%p4948_p3), [#allocation4], %s4391_s10  ;;  %s4397_s6 = scalar_lea.vmem (!%p4948_p3), [#allocation3], %s4900_s1 }
 0x17a   : > { %3808 = dma.done.wait (%p4334_p6), %s678_s27, 128  }
 0x17b   : > { %3810 = vsyncadd (%p4334_p6), %s678_s27, 4294967168  ;;  %p4949_p10 = scmp.eq.s32.totalorder %s4041_s2, 0 }
 0x17d   : > { %3812 = dma.done.wait (%p4949_p10), [#allocation7], 32   ;;  %p4950_p11 = pmov %p4949_p10 }
 0x17e   : > { %p4951_p12 = pmov %p4949_p10 }
 0x17f   : > { %3814 = vsyncadd (%p4950_p11), [#allocation7], 4294967264 }
 0x180   : > { %3816 = dma.done.wait (%p4951_p12), [#allocation10], 528   ;;  %p4952_p8 = pmov %p4949_p10 }
 0x182   : > { %3818 = vsyncadd (%p4952_p8), [#allocation10], 4294966768  ;;  %p4953_p5 = pmov %p4952_p8 }
 0x184   : > { %3820 = dma.done.wait (%p4953_p5), [#allocation13], 32   ;;  %p4954_p7 = pmov %p4953_p5 }
 0x185   : > { %p4955_p6 = pmov %p4953_p5 }
 0x186   : > { %3822 = vsyncadd (%p4954_p7), [#allocation13], 4294967264 }
 0x187   : > { %3824 = dma.done.wait (%p4955_p6), [#allocation16], 528   ;;  %p4956_p9 = pmov %p4953_p5 }
 0x188   : > { %p4957_p4 = pmov %p4953_p5 }
 0x189   : > { %3826 = vsyncadd (%p4956_p9), [#allocation16], 4294966768 }
 0x18a   : > { %3828 = dma.done.wait (%p4957_p4), [#allocation19], 32   ;;  %p4958_p1 = pmov %p4957_p4 }
 0x18c   : > { %3830 = vsyncadd (%p4958_p1), [#allocation19], 4294967264  ;;  %p4959_p13 = pmov %p4958_p1 }
 0x18d   : > { %p4960_p0 = pmov %p4958_p1 }
 0x18e   : > { %3832 = dma.done.wait (%p4959_p13), [#allocation22], 528  }
 0x18f   : > { %3834 = vsyncadd (%p4960_p0), [#allocation22], 4294966768  ;;  %p789_p2 = scmp.lt.s32.totalorder %s4041_s2, 1  ;;  %s4961_s9 = sld [smem:[#allocation33_spill]]  ;;  %vm4905_vm0 = vcmask 261120   ;;  %v3870_v17 = vmov 0.0|0.0  }
 0x190   : > { %s4962_s17 = sld [smem:[#allocation37_spill]]  ;;  %s4963_s22 = sld [smem:[#allocation38_spill]]  ;;  %3062 = vmatprep.subr.bf16.mxu0 %v3870_v17  ;;  %vm3871_vm1 = vmmov 0   ;;  %v3872_v22 = vmov 0.0   ;;  %v927_v28 = vld [vmem:[#allocation9] sm:$0xff]  ;;  %v928_v29 = vld [vmem:[#allocation9 + $0x8] sm:$0xff] }
 0x191   : > { %s790_s7 = scalar_select %p789_p2, %s4041_s2, 1  ;;  %2935 = vmatprep.mubr.msk.f32.mxu0 %vm3871_vm1, %v3872_v22  ;;  %v3054_v30 = vpack.c.bf16 %v928_v29, %v927_v28  ;;  %v2800_v38 = vld [vmem:[#allocation6] ss:$0 sm:$0xff]  ;;  %v2801_v40 = vld [vmem:[#allocation8] ss:$0 sm:$0xff]  ;;  %v929_v46 = vld [vmem:[#allocation9 + $0x10] sm:$0xff] }
 0x192   : > { %v930_v47 = vld [vmem:[#allocation9 + $0x18] sm:$0xff]  ;;  %s4964_s18 = sld [smem:[#allocation42_spill]]  ;;  %vm1274_vm2 = vcmask 64512   ;;  %s3874_s8 = smov 112   ;;  %vm1189_vm4 = vcmask 7168   ;;  %vm1197_vm5 = vcmask 15360  }
 0x193   : > { %s2839_s23 = sshll.u32 %s790_s7, 4  ;;  %v3058_v49 = vpack.c.bf16 %v930_v47, %v929_v46  ;;  %vm4498_vm3 = vmpackc.low %vm1274_vm2, %vm1274_vm2  ;;  %s4903_s1 = smov 114   ;;  %vm4914_vm6 = vcmask 23552   ;;  %vm1213_vm7 = vcmask 31744   ;;  %vm1221_vm8 = vcmask 39936  }
 0x194   : > { %s4902_s5 = smov 115   ;;  %s3878_s24 = smov 2   ;;  %vm4906_vm9 = vcmask 48128   ;;  %vm1260_vm10 = vcmask 1040384   ;;  %vm1262_vm11 = vcmask 1041408   ;;  %vm4907_vm12 = vcmask 1042432  }
 0x195   : > { %s4432_s19 = scalar_lea.vmem %s4961_s9, %s2839_s23  ;;  %s3873_s23 = smov 113   ;;  %vm1266_vm13 = vcmask 1043456   ;;  %vm1237_vm14 = vcmask 56320   ;;  %vm1268_vm15 = vcmask 1044480  }
 0x196   : > { %v795_v0 = vld [vmem:[%s4432_s19 + $0x8] sm:$0xff]  ;;  %v794_v1 = vld [vmem:[%s4432_s19] sm:$0xff]  ;;  %v1015_v20 = vld [vmem:[%s4962_s17 + $0x10] sm:$0xff]  ;;  %s3876_s9 = smov 1   ;;  %s4904_s4 = smov 116  }
 0x197   : > { %v802_v2 = vsel %vm4905_vm0, %v795_v0, 0.0  ;;  %v799_v3 = vsel %vm4905_vm0, %v794_v1, 0.0  ;;  %v1013_v14 = vld [vmem:[%s4962_s17] sm:$0xff]  ;;  %v1014_v15 = vld [vmem:[%s4962_s17 + $0x8] sm:$0xff]  ;;  %v1016_v21 = vld [vmem:[%s4962_s17 + $0x18] sm:$0xff]  ;;  %s3880_s27 = smov 3  }
 0x198   : > { %803 = vadd.xlane.f32.xlu0 %v802_v2  ;;  %v842_v16 = vld [vmem:[%s4963_s22] sm:$0xff]  ;;  %v3063_v18 = vpack.c.bf16 %v1014_v15, %v1013_v14  ;;  %v843_v19 = vld [vmem:[%s4963_s22 + $0x8] sm:$0xff]  ;;  %v844_v24 = vld [vmem:[%s4963_s22 + $0x10] sm:$0xff]  ;;  %v3066_v26 = vpack.c.bf16 %v1016_v21, %v1015_v20  ;;  %s3881_s7 = smov 117   ;;  %p4993_p10 = scmp.ne.s32.totalorder %s4944_s29, 0 }
 0x199   : > { %v3046_v23 = vpack.c.bf16 %v843_v19, %v842_v16  ;;  %v845_v25 = vld [vmem:[%s4963_s22 + $0x18] sm:$0xff]  ;;  %v1096_v50 = vld [vmem:[%s4964_s18] sm:$0xff]  ;;  %v1097_v51 = vld [vmem:[%s4964_s18 + $0x8] sm:$0xff] }
 0x19a   : > { %3064 = vmatpush3.bf16.msra.mxu0 %v3063_v18  ;;  %v3050_v27 = vpack.c.bf16 %v845_v25, %v844_v24  ;;  %v3069_v52 = vpack.c.bf16 %v1097_v51, %v1096_v50  ;;  %v1098_v53 = vld [vmem:[%s4964_s18 + $0x10] sm:$0xff]  ;;  %v1099_v54 = vld [vmem:[%s4964_s18 + $0x18] sm:$0xff] }
 0x19b   : > { %3047 = vmatprep.subr.bf16.mxu1 %v3046_v23  ;;  %3065 = vmatprep.subr.bf16.mxu0 %v3870_v17  ;;  %v3072_v55 = vpack.c.bf16 %v1099_v54, %v1098_v53 }
 0x19c   : > { %800 = vadd.xlane.f32.xlu0 %v799_v3  ;;  %3049 = vmatpush3.bf16.msra.mxu1 %v3046_v23 }
 0x19d   : > { %3051 = vmatprep.subr.bf16.mxu1 %v3050_v27 }
 0x19e   : > { %3067 = vmatpush3.bf16.msra.mxu0 %v3066_v26 }
 0x19f   : > { %3074 = vmatprep.subr.bf16.mxu0 %v3870_v17 }
 0x1a0   : > { %3053 = vmatpush3.bf16.msra.mxu1 %v3050_v27 }
 0x1a1   : > { %3055 = vmatprep.subr.bf16.mxu1 %v3054_v30 }
 0x225   : > { %v804_v4 = vpop.xlane.xlu0 %803 }
 0x226   : > { %v807_v5 = vmul.f32 0.03125, %v804_v4 }
 0x228   : > { %v809_v6 = vsub.f32 %v795_v0, %v807_v5  ;;  %v2808_v0 = vld [vmem:[#allocation12] ss:$0 sm:$0xff] }
 0x229   : > { %v801_v7 = vpop.xlane.xlu0 %800 }
 0x22a   : > { %v806_v8 = vmul.f32 0.03125, %v801_v7  ;;  %v811_v9 = vmul.f32 %v809_v6, %v809_v6 }
 0x22c   : > { %v808_v10 = vsub.f32 %v794_v1, %v806_v8  ;;  %v815_v11 = vsel %vm4905_vm0, %v811_v9, 0.0  ;;  %v2804_v1 = vld [vmem:[#allocation11] ss:$0 sm:$0xff]  ;;  %v2809_v9 = vld [vmem:[#allocation14] ss:$0 sm:$0xff] }
 0x22d   : > { %816 = vadd.xlane.f32.xlu1 %v815_v11 }
 0x22e   : > { %v810_v12 = vmul.f32 %v808_v10, %v808_v10 }
 0x230   : > { %v812_v13 = vsel %vm4905_vm0, %v810_v12, 0.0 }
 0x231   : > { %813 = vadd.xlane.f32.xlu1 %v812_v13 }
 0x2ba   : > { %v817_v31 = vpop.xlane.xlu1 %816 }
 0x2bb   : > { %v819_v32 = vmul.f32 0.03125, %v817_v31 }
 0x2bd   : > { %v821_v33 = vadd.f32 1e-05, %v819_v32 }
 0x2be   : > { %v814_v34 = vpop.xlane.xlu1 %813 }
 0x2bf   : > { %3374 = vrsqrt.f32 %v821_v33  ;;  %v818_v35 = vmul.f32 0.03125, %v814_v34 }
 0x2c1   : > { %v820_v36 = vadd.f32 1e-05, %v818_v35 }
 0x2c3   : > { %3376 = vrsqrt.f32 %v820_v36 }
 0x2c9   : > { %v3375_v37 = vpop.eup %3374 }
 0x2ca   : > { %v825_v39 = vmul.f32 %v3375_v37, %v809_v6 }
 0x2cc   : > { %v833_v41 = vmul.f32 %v2800_v38, %v825_v39 }
 0x2cd   : > { %v3377_v42 = vpop.eup %3376 }
 0x2ce   : > { %v841_v43 = vadd.f32 %v2801_v40, %v833_v41  ;;  %v824_v44 = vmul.f32 %v3377_v42, %v808_v10 }
 0x2d0   : > { %2936 = vmatmul.mubr.msk.f32.vlgmr.msra.gmra.mrb[0].mxu0 %vm4905_vm0, %v841_v43  ;;  %v832_v45 = vmul.f32 %v2800_v38, %v824_v44 }
 0x2d1   : > { %2953 = vmatprep.mubr.msk.f32.mxu0 %vm3871_vm1, %v3872_v22 }
 0x2d2   : > { %v840_v48 = vadd.f32 %v2801_v40, %v832_v45 }
 0x2d4   : > { %2913 = vmatprep.mubr.msk.f32.mxu1 %vm4905_vm0, %v840_v48 }
 0x2d5   : > { %2914 = vmatmul.mubr.msk.f32.vlgmr.msra.gmra.mrb[0].mxu1 %vm4905_vm0, %v841_v43 }
 0x2d6   : > { %3057 = vmatpush3.bf16.msra.mxu1 %v3054_v30  ;;  %2924 = vmatprep.mubr.msk.f32.mxu1 %vm4905_vm0, %v840_v48 }
 0x2d7   : > { %3059 = vmatprep.subr.bf16.mxu1 %v3058_v49 }
 0x2da   : > { %3061 = vmatpush3.bf16.msra.mxu1 %v3058_v49 }
 0x2db   : > { %3068 = vmatprep.subr.bf16.mxu1 %v3870_v17 }
 0x2dd   : > { %2925 = vmatmul.mubr.msk.f32.vlgmr.msra.gmra.mrb[2].mxu1 %vm4905_vm0, %v841_v43 }
 0x2de   : > { %3070 = vmatpush3.bf16.msra.mxu1 %v3069_v52  ;;  %2946 = vmatprep.mubr.msk.f32.mxu1 %vm3871_vm1, %v3872_v22  ;;  %v4559_v52 = vld [vmem:[%s4397_s6] sm:$0xff]  ;;  %s3889_s6 = smov 96  }
 0x2df   : > { %3071 = vmatprep.subr.bf16.mxu1 %v3870_v17 }
 0x2e2   : > { %3073 = vmatpush3.bf16.msra.mxu1 %v3072_v55 }
 0x2e3   : > { %3078 = vmatprep.subr.bf16.mxu1 %v3870_v17 }
 0x3a3   : > { %v1083_v56 = vpop.f32.mrb[0].mxu0 }
 0x3a4   : > { %v1087_v57 = vmul.f32 0.35355338, %v1083_v56  ;;  %v2937_v58 = vpop.f32.mrb[1].mxu0 }
 0x3a6   : > { %2947 = vmatmul.mubr.msk.f32.vlgmr.msra.gmra.mrb[4].mxu1 %vm4905_vm0, %v1087_v57  ;;  %v4507_v3 = vadd.f32 %v2808_v0, %v1087_v57  ;;  %vm1270_vm0 = vcmask 1045504  }
 0x3a7   : > { %2960 = vmatprep.mubr.msk.f32.mxu1 %vm3871_vm1, %v3872_v22 }
 0x3a8   : > { %v2915_v59 = vpop.f32.mrb[0].mxu1 }
 0x3a9   : > { %v918_v60 = vpop.f32.mrb[1].mxu1 }
 0x3aa   : > { %v3075_v62 = vpack.c.bf16 %v2915_v59, %v918_v60  ;;  %v4502_v63 = vpack.i.bf16 %v2915_v59, %v918_v60 }
 0x3ac   : > { %3077 = vmatpush3.bf16.xpose.msk.msra.mxu0 %vm4498_vm3, %v3075_v62 }
 0x3ad   : > { %3085 = vmatprep.subr.bf16.mxu0 %v3870_v17 }
 0x3b0   : > { %v2926_v2 = vpop.f32.mrb[2].mxu1 }
 0x3b1   : > { %v1010_v4 = vadd.f32 %v2926_v2, %v2804_v1  ;;  %v1004_v5 = vpop.f32.mrb[3].mxu1 }
 0x3b2   : > { %v1005_v6 = vadd.f32 %v2804_v1, %v1004_v5 }
 0x3b3   : > { %2954 = vmatmul.mubr.msk.f32.vlgmr.msra.gmra.mrb[2].mxu0 %vm1274_vm2, %v4507_v3 }
 0x3b4   : > { %v3079_v7 = vpack.c.bf16 %v1010_v4, %v1005_v6  ;;  %v4511_v8 = vpack.i.bf16 %v1010_v4, %v1005_v6  ;;  %2974 = vmatprep.mubr.msk.f32.mxu0 %vm3871_vm1, %v3872_v22 }
 0x3b6   : > { %3080 = vmatpush3.bf16.msra.mxu1 %v3079_v7 }
 0x3b7   : > { %3081 = vmatprep.subr.bf16.mxu1 %v3870_v17 }
 0x479   : > { %v1176_v10 = vpop.f32.mrb[4].mxu1 }
 0x47a   : > { %v4516_v11 = vadd.f32 %v2809_v9, %v1176_v10  ;;  %v2948_v12 = vpop.f32.mrb[5].mxu1 }
 0x47c   : > { %1191 = vrot.lane.b32.xlu1 %v4516_v11, %s3873_s23  ;;  %1182 = vrot.lane.b32.xlu0 %v4516_v11, %s3874_s8  ;;  %v4523_v13 = vrot.slane %v4516_v11, 1 }
 0x480   : > { %1199 = vrot.lane.b32.xlu0 %v4516_v11, %s4903_s1  ;;  %1186 = vrot.lane.b32.xlu1 %v4523_v13, %s3876_s9  ;;  %s3882_s9 = smov 4   ;;  %s3885_s1 = smov 6  }
 0x484   : > { %1207 = vrot.lane.b32.xlu0 %v4516_v11, %s4902_s5  ;;  %1194 = vrot.lane.b32.xlu1 %v4523_v13, %s3878_s24  ;;  %s4908_s5 = smov 118   ;;  %s3884_s24 = smov 5  }
 0x486   : > { %v4531_v14 = vpop.f32.mrb[2].mxu0 }
 0x487   : > { %v2955_v15 = vpop.f32.mrb[3].mxu0 }
 0x488   : > { %1215 = vrot.lane.b32.xlu0 %v4516_v11, %s4904_s4  ;;  %1202 = vrot.lane.b32.xlu1 %v4523_v13, %s3880_s27  ;;  %s3886_s4 = smov 7   ;;  %s3890_s27 = smov 97  }
 0x48c   : > { %1223 = vrot.lane.b32.xlu0 %v4516_v11, %s3881_s7  ;;  %1210 = vrot.lane.b32.xlu1 %v4523_v13, %s3882_s9  ;;  %s4913_s9 = smov 98  }
 0x490   : > { %1231 = vrot.lane.b32.xlu0 %v4516_v11, %s4908_s5  ;;  %1218 = vrot.lane.b32.xlu1 %v4523_v13, %s3884_s24  ;;  %s4912_s24 = smov 99   ;;  %s4910_s5 = smov 100  }
 0x494   : > { %1226 = vrot.lane.b32.xlu1 %v4523_v13, %s3885_s1  ;;  %s3887_s1 = smov 120  }
 0x498   : > { %1234 = vrot.lane.b32.xlu1 %v4523_v13, %s3886_s4  ;;  %s4909_s4 = smov 95  }
 0x4ee   : > { %v1192_v16 = vpop.permute.xlu1 %1191  ;;  %v1183_v18 = vpop.permute.xlu0 %1182 }
 0x4f2   : > { %v1200_v19 = vpop.permute.xlu0 %1199  ;;  %v1187_v20 = vpop.permute.xlu1 %1186 }
 0x4f3   : > { %v1190_v27 = vsel %vm1189_vm4, %v1183_v18, %v1187_v20 }
 0x4f4   : > { %v1240_v31 = vrot.slane %v1190_v27, 7 }
 0x4f6   : > { %v1195_v21 = vpop.permute.xlu1 %1194  ;;  %v1208_v23 = vpop.permute.xlu0 %1207  ;;  %v1261_v40 = vsel %vm1260_vm10, %v4516_v11, %v1240_v31 }
 0x4f7   : > { %v1198_v28 = vsel %vm1197_vm5, %v1192_v16, %v1195_v21 }
 0x4f8   : > { %v1243_v34 = vrot.slane %v1198_v28, 7 }
 0x4fa   : > { %v1203_v24 = vpop.permute.xlu1 %1202  ;;  %v1216_v25 = vpop.permute.xlu0 %1215  ;;  %v1263_v42 = vsel %vm1262_vm11, %v1261_v40, %v1243_v34 }
 0x4fb   : > { %v1206_v30 = vsel %vm4914_vm6, %v1200_v19, %v1203_v24 }
 0x4fc   : > { %v1246_v36 = vrot.slane %v1206_v30, 7 }
 0x4fe   : > { %v1211_v26 = vpop.permute.xlu1 %1210  ;;  %v1224_v32 = vpop.permute.xlu0 %1223  ;;  %v1265_v44 = vsel %vm4907_vm12, %v1263_v42, %v1246_v36  ;;  %vm1355_vm12 = vcmask 130048  }
 0x4ff   : > { %v1214_v33 = vsel %vm1213_vm7, %v1208_v23, %v1211_v26 }
 0x500   : > { %v1249_v38 = vrot.slane %v1214_v33, 7 }
 0x502   : > { %v1219_v29 = vpop.permute.xlu1 %1218  ;;  %v1232_v45 = vpop.permute.xlu0 %1231  ;;  %v1267_v47 = vsel %vm1266_vm13, %v1265_v44, %v1249_v38 }
 0x503   : > { %v1222_v35 = vsel %vm1221_vm8, %v1216_v25, %v1219_v29 }
 0x504   : > { %v1252_v41 = vrot.slane %v1222_v35, 7 }
 0x506   : > { %v1227_v37 = vpop.permute.xlu1 %1226  ;;  %v1269_v49 = vsel %vm1268_vm15, %v1267_v47, %v1252_v41 }
 0x507   : > { %v1230_v39 = vsel %vm4906_vm9, %v1224_v32, %v1227_v37  ;;  %vm1272_vm9 = vcmask 1046528  }
 0x508   : > { %v1255_v43 = vrot.slane %v1230_v39, 7 }
 0x50a   : > { %v1235_v46 = vpop.permute.xlu1 %1234  ;;  %v1271_v51 = vsel %vm1270_vm0, %v1269_v49, %v1255_v43 }
 0x50b   : > { %v1238_v48 = vsel %vm1237_vm14, %v1232_v45, %v1235_v46 }
 0x50c   : > { %v1258_v50 = vrot.slane %v1238_v48, 7 }
 0x50e   : > { %v1273_v53 = vsel %vm1272_vm9, %v1271_v51, %v1258_v50 }
 0x50f   : > { %v1351_v54 = vadd.f32 %v4531_v14, %v1273_v53 }
 0x511   : > { %v1354_v55 = vadd.f32 %v1351_v54, %v4559_v52 }
 0x513   : > { %v1356_v56 = vsel %vm1355_vm12, %v1354_v55, -inf }
 0x514   : > { %1357 = vmax.xlane.f32.xlu0 %v1356_v56 }
 0x52a   : > { %3345 = vrot.lane.b32.xlu0 %v4502_v63, %s3887_s1 }
 0x52e   : > { %1441 = vrot.lane.b32.xlu0 %v4516_v11, %s4909_s4  ;;  %s4911_s4 = smov 101  }
 0x532   : > { %1448 = vrot.lane.b32.xlu0 %v4516_v11, %s3889_s6 }
 0x536   : > { %1455 = vrot.lane.b32.xlu0 %v4516_v11, %s3890_s27 }
 0x53a   : > { %1462 = vrot.lane.b32.xlu0 %v4516_v11, %s4913_s9  ;;  %s4970_s9 = smov 118  }
 0x53e   : > { %1469 = vrot.lane.b32.xlu0 %v4516_v11, %s4912_s24  ;;  %s4969_s24 = smov 116  }
 0x542   : > { %1476 = vrot.lane.b32.xlu0 %v4516_v11, %s4910_s5  ;;  %s4967_s5 = smov 114  }
 0x546   : > { %1483 = vrot.lane.b32.xlu0 %v4516_v11, %s4911_s4  ;;  %s4968_s4 = smov 115  }
 0x5a1   : > { %v1358_v57 = vpop.xlane.xlu0 %1357 }
 0x5a2   : > { %v1359_v58 = vsub.f32 %v1354_v55, %v1358_v57 }
 0x5a4   : > { %v1360_v59 = vmul.f32 1.442695, %v1359_v58 }
 0x5a5   : > { %v3346_v0 = vpop.permute.xlu0 %3345 }
 0x5a6   : > { %3378 = vpow2.f32 %v1360_v59  ;;  %v3348_v9 = vunpack.i.h.bf16 %v3346_v0  ;;  %v3347_v10 = vunpack.i.l.bf16 %v3346_v0 }
 0x5a8   : > { %v3082_v19 = vpack.c.bf16 %v3348_v9, %v3347_v10 }
 0x5a9   : > { %v1442_v1 = vpop.permute.xlu0 %1441 }
 0x5ad   : > { %v1449_v4 = vpop.permute.xlu0 %1448 }
 0x5b0   : > { %v3379_v60 = vpop.eup %3378 }
 0x5b1   : > { %v1362_v62 = vsel %vm1355_vm12, %v3379_v60, 0.0  ;;  %v1456_v6 = vpop.permute.xlu0 %1455 }
 0x5b2   : > { %1363 = vadd.xlane.f32.xlu1 %v1362_v62 }
 0x5b5   : > { %v1463_v21 = vpop.permute.xlu0 %1462 }
 0x5b9   : > { %v1470_v27 = vpop.permute.xlu0 %1469 }
 0x5bd   : > { %v1477_v33 = vpop.permute.xlu0 %1476 }
 0x5c1   : > { %v1484_v38 = vpop.permute.xlu0 %1483 }
 0x5c3   : > { %1532 = vrot.lane.b32.xlu1 %v4507_v3, %s3887_s1 }
 0x5c7   : > { %1444 = vrot.lane.b32.xlu1 %v4523_v13, %s3874_s8 }
 0x5cb   : > { %1451 = vrot.lane.b32.xlu1 %v4523_v13, %s3873_s23  ;;  %s3895_s23 = smov 17  }
 0x5cf   : > { %1458 = vrot.lane.b32.xlu1 %v4523_v13, %s4967_s5  ;;  %s3896_s5 = smov 111  }
 0x5d3   : > { %1465 = vrot.lane.b32.xlu1 %v4523_v13, %s4968_s4  ;;  %s4974_s4 = smov 98  }
 0x5d7   : > { %1472 = vrot.lane.b32.xlu1 %v4523_v13, %s4969_s24  ;;  %s4976_s24 = smov 100  }
 0x5db   : > { %1479 = vrot.lane.b32.xlu1 %v4523_v13, %s3881_s7  ;;  %s4973_s7 = smov 95  }
 0x5df   : > { %1486 = vrot.lane.b32.xlu1 %v4523_v13, %s4970_s9  ;;  %s4975_s9 = smov 99  }
 0x63f   : > { %v1364_v2 = vpop.xlane.xlu1 %1363 }
 0x640   : > { %3380 = vrcp.f32 %v1364_v2 }
 0x643   : > { %v1533_v5 = vpop.permute.xlu1 %1532 }
 0x647   : > { %v1445_v7 = vpop.permute.xlu1 %1444 }
 0x648   : > { %v1447_v12 = vsel %vm1189_vm4, %v1442_v1, %v1445_v7 }
 0x649   : > { %v1491_v14 = vrot.slane %v1447_v12, 7 }
 0x64a   : > { %v3381_v15 = vpop.eup %3380 }
 0x64b   : > { %v1366_v16 = vmul.f32 %v3381_v15, %v3379_v60  ;;  %v1452_v18 = vpop.permute.xlu1 %1451  ;;  %1492 = vrot.lane.b32.xlu0 %v1491_v14, %s3895_s23 }
 0x64c   : > { %v1454_v20 = vsel %vm1197_vm5, %v1449_v4, %v1452_v18 }
 0x64d   : > { %v1496_v23 = vrot.slane %v1454_v20, 7  ;;  %2961 = vmatmul.mubr.msk.f32.vlgmr.msra.gmra.mrb[6].mxu1 %vm1355_vm12, %v1366_v16 }
 0x64e   : > { %3084 = vmatpush3.bf16.xpose.msk.msra.mxu1 %vm4498_vm3, %v3082_v19  ;;  %2967 = vmatprep.mubr.msk.f32.mxu1 %vm3871_vm1, %v3872_v22 }
 0x64f   : > { %v1459_v24 = vpop.permute.xlu1 %1458  ;;  %1497 = vrot.lane.b32.xlu1 %v1496_v23, %s3895_s23  ;;  %3092 = vmatprep.subr.bf16.mxu1 %v3870_v17 }
 0x650   : > { %v1461_v25 = vsel %vm4914_vm6, %v1456_v6, %v1459_v24  ;;  %vm4971_vm6 = vcmask 48128  }
 0x651   : > { %v1501_v26 = vrot.slane %v1461_v25, 7 }
 0x653   : > { %v1466_v28 = vpop.permute.xlu1 %1465  ;;  %1502 = vrot.lane.b32.xlu0 %v1501_v26, %s3895_s23 }
 0x654   : > { %v1468_v29 = vsel %vm1213_vm7, %v1463_v21, %v1466_v28 }
 0x655   : > { %v1506_v30 = vrot.slane %v1468_v29, 7  ;;  %2968 = vmatmul.mubr.msk.f32.vlgmr.msra.gmra.mrb[8].mxu1 %vm1274_vm2, %v1533_v5 }
 0x656   : > { %2988 = vmatprep.mubr.msk.f32.mxu1 %vm3871_vm1, %v3872_v22 }
 0x657   : > { %v1473_v31 = vpop.permute.xlu1 %1472  ;;  %1507 = vrot.lane.b32.xlu1 %v1506_v30, %s3895_s23 }
 0x658   : > { %v1475_v32 = vsel %vm1221_vm8, %v1470_v27, %v1473_v31 }
 0x659   : > { %v1511_v34 = vrot.slane %v1475_v32, 7 }
 0x65b   : > { %v1480_v35 = vpop.permute.xlu1 %1479  ;;  %1512 = vrot.lane.b32.xlu0 %v1511_v34, %s3895_s23 }
 0x65c   : > { %v1482_v36 = vsel %vm4971_vm6, %v1477_v33, %v1480_v35  ;;  %vm4972_vm6 = vcmask 1042432  }
 0x65d   : > { %v1516_v37 = vrot.slane %v1482_v36, 7 }
 0x65f   : > { %v1487_v39 = vpop.permute.xlu1 %1486  ;;  %1517 = vrot.lane.b32.xlu1 %v1516_v37, %s3895_s23 }
 0x660   : > { %v1489_v40 = vsel %vm1237_vm14, %v1484_v38, %v1487_v39 }
 0x661   : > { %v1521_v41 = vrot.slane %v1489_v40, 7 }
 0x663   : > { %1522 = vrot.lane.b32.xlu0 %v1521_v41, %s3895_s23  ;;  %s3899_s23 = smov 80  }
 0x6bd   : > { %v1493_v42 = vpop.permute.xlu0 %1492 }
 0x6be   : > { %v1525_v46 = vsel %vm1260_vm10, %v4516_v11, %v1493_v42 }
 0x6c1   : > { %v1498_v43 = vpop.permute.xlu1 %1497 }
 0x6c2   : > { %v1526_v47 = vsel %vm1262_vm11, %v1525_v46, %v1498_v43 }
 0x6c5   : > { %v1503_v44 = vpop.permute.xlu0 %1502 }
 0x6c6   : > { %v1527_v49 = vsel %vm4972_vm6, %v1526_v47, %v1503_v44  ;;  %vm4978_vm6 = vcmask 23552  }
 0x6c9   : > { %v1508_v45 = vpop.permute.xlu1 %1507 }
 0x6ca   : > { %v1528_v51 = vsel %vm1266_vm13, %v1527_v49, %v1508_v45 }
 0x6cd   : > { %v1513_v48 = vpop.permute.xlu0 %1512 }
 0x6ce   : > { %v1529_v53 = vsel %vm1268_vm15, %v1528_v51, %v1513_v48 }
 0x6d1   : > { %v1518_v50 = vpop.permute.xlu1 %1517 }
 0x6d2   : > { %v1530_v54 = vsel %vm1270_vm0, %v1529_v53, %v1518_v50 }
 0x6d5   : > { %v1523_v55 = vpop.permute.xlu0 %1522 }
 0x6d6   : > { %v1531_v56 = vsel %vm1272_vm9, %v1530_v54, %v1523_v55 }
 0x6d7   : > { %1539 = vrot.lane.b32.xlu1 %v1531_v56, %s3896_s5  ;;  %s3900_s5 = smov 81  }
 0x720   : > { %v1436_v57 = vpop.f32.mrb[6].mxu1 }
 0x721   : > { %1440 = vst.msk [vmem:[#allocation2] sm:$0xff] %vm1274_vm2, %v1436_v57  ;;  %v2962_v58 = vpop.f32.mrb[7].mxu1 }
 0x728   : > { %v1614_v59 = vpop.f32.mrb[8].mxu1 }
 0x729   : > { %v2969_v60 = vpop.f32.mrb[9].mxu1 }
 0x749   : > { %v1540_v62 = vpop.permute.xlu1 %1539 }
 0x74a   : > { %v1615_v0 = vadd.f32 %v1614_v59, %v1540_v62 }
 0x74c   : > { %v1618_v1 = vadd.f32 %v1615_v0, %v4559_v52 }
 0x74e   : > { %v1619_v2 = vsel %vm1355_vm12, %v1618_v1, -inf }
 0x74f   : > { %1620 = vmax.xlane.f32.xlu0 %v1619_v2 }
 0x765   : > { %3350 = vrot.lane.b32.xlu0 %v4511_v8, %s3887_s1  ;;  %s4977_s1 = smov 101  }
 0x769   : > { %1808 = vrot.lane.b32.xlu0 %v4507_v3, %s3874_s8 }
 0x76d   : > { %1720 = vrot.lane.b32.xlu0 %v4523_v13, %s4973_s7  ;;  %s3901_s7 = smov 82  }
 0x771   : > { %1727 = vrot.lane.b32.xlu0 %v4523_v13, %s3889_s6  ;;  %s3897_s6 = smov 78  }
 0x775   : > { %1734 = vrot.lane.b32.xlu0 %v4523_v13, %s3890_s27  ;;  %s3898_s27 = smov 79  }
 0x779   : > { %1741 = vrot.lane.b32.xlu0 %v4523_v13, %s4974_s4  ;;  %s3902_s4 = smov 83  }
 0x77d   : > { %1748 = vrot.lane.b32.xlu0 %v4523_v13, %s4975_s9  ;;  %s3903_s9 = smov 84  }
 0x781   : > { %1755 = vrot.lane.b32.xlu0 %v4523_v13, %s4976_s24  ;;  %s3904_s24 = smov 34  }
 0x785   : > { %1762 = vrot.lane.b32.xlu0 %v4523_v13, %s4977_s1  ;;  %s3905_s1 = smov 94  }
 0x7dc   : > { %v1621_v4 = vpop.xlane.xlu0 %1620 }
 0x7dd   : > { %v1622_v5 = vsub.f32 %v1618_v1, %v1621_v4 }
 0x7df   : > { %v1623_v6 = vmul.f32 1.442695, %v1622_v5 }
 0x7e0   : > { %v3351_v7 = vpop.permute.xlu0 %3350 }
 0x7e1   : > { %3382 = vpow2.f32 %v1623_v6  ;;  %v3353_v9 = vunpack.i.h.bf16 %v3351_v7  ;;  %v3352_v10 = vunpack.i.l.bf16 %v3351_v7 }
 0x7e3   : > { %v3086_v12 = vpack.c.bf16 %v3353_v9, %v3352_v10 }
 0x7e4   : > { %v1809_v16 = vpop.permute.xlu0 %1808 }
 0x7e5   : > { %3087 = vmatpush3.bf16.msra.mxu0 %v3086_v12 }
 0x7e6   : > { %3088 = vmatprep.subr.bf16.mxu0 %v3870_v17 }
 0x7e8   : > { %v1721_v18 = vpop.permute.xlu0 %1720 }
 0x7eb   : > { %v3383_v14 = vpop.eup %3382 }
 0x7ec   : > { %v1625_v15 = vsel %vm1355_vm12, %v3383_v14, 0.0  ;;  %v1728_v20 = vpop.permute.xlu0 %1727 }
 0x7ed   : > { %1626 = vadd.xlane.f32.xlu1 %v1625_v15 }
 0x7f0   : > { %v1735_v23 = vpop.permute.xlu0 %1734 }
 0x7f4   : > { %v1742_v34 = vpop.permute.xlu0 %1741 }
 0x7f8   : > { %v1749_v39 = vpop.permute.xlu0 %1748 }
 0x7fc   : > { %v1756_v45 = vpop.permute.xlu0 %1755 }
 0x7fe   : > { %3355 = vrot.lane.b32.xlu1 %v4502_v63, %s3874_s8 }
 0x800   : > { %v1763_v50 = vpop.permute.xlu0 %1762 }
 0x802   : > { %1717 = vrot.lane.b32.xlu1 %v4516_v11, %s3897_s6 }
 0x806   : > { %1724 = vrot.lane.b32.xlu1 %v4516_v11, %s3898_s27 }
 0x80a   : > { %1731 = vrot.lane.b32.xlu1 %v4516_v11, %s3899_s23 }
 0x80e   : > { %1738 = vrot.lane.b32.xlu1 %v4516_v11, %s3900_s5 }
 0x812   : > { %1745 = vrot.lane.b32.xlu1 %v4516_v11, %s3901_s7 }
 0x816   : > { %1752 = vrot.lane.b32.xlu1 %v4516_v11, %s3902_s4 }
 0x81a   : > { %1759 = vrot.lane.b32.xlu1 %v4516_v11, %s3903_s9 }
 0x87a   : > { %v1627_v19 = vpop.xlane.xlu1 %1626 }
 0x87b   : > { %3384 = vrcp.f32 %v1627_v19 }
 0x87e   : > { %v3356_v21 = vpop.permute.xlu1 %3355 }
 0x87f   : > { %v3358_v25 = vunpack.i.h.bf16 %v3356_v21  ;;  %v3357_v26 = vunpack.i.l.bf16 %v3356_v21 }
 0x881   : > { %v3089_v32 = vpack.c.bf16 %v3358_v25, %v3357_v26 }
 0x882   : > { %v1718_v24 = vpop.permute.xlu1 %1717 }
 0x883   : > { %v1723_v27 = vsel %vm1189_vm4, %v1718_v24, %v1721_v18 }
 0x884   : > { %v1767_v28 = vrot.slane %v1723_v27, 7 }
 0x885   : > { %v3385_v29 = vpop.eup %3384 }
 0x886   : > { %v1629_v30 = vmul.f32 %v3385_v29, %v3383_v14  ;;  %v1725_v31 = vpop.permute.xlu1 %1724  ;;  %1768 = vrot.lane.b32.xlu1 %v1767_v28, %s3904_s24 }
 0x887   : > { %v1730_v33 = vsel %vm1197_vm5, %v1725_v31, %v1728_v20 }
 0x888   : > { %v1772_v35 = vrot.slane %v1730_v33, 7  ;;  %2975 = vmatmul.mubr.msk.f32.vlgmr.msra.gmra.mrb[4].mxu0 %vm1355_vm12, %v1629_v30 }
 0x889   : > { %3091 = vmatpush3.bf16.xpose.msk.msra.mxu0 %vm4498_vm3, %v3089_v32  ;;  %2981 = vmatprep.mubr.msk.f32.mxu0 %vm3871_vm1, %v3872_v22 }
 0x88a   : > { %v1732_v36 = vpop.permute.xlu1 %1731  ;;  %1773 = vrot.lane.b32.xlu0 %v1772_v35, %s3904_s24  ;;  %3099 = vmatprep.subr.bf16.mxu0 %v3870_v17 }
 0x88b   : > { %v1737_v37 = vsel %vm4978_vm6, %v1732_v36, %v1735_v23  ;;  %vm4979_vm6 = vcmask 48128  }
 0x88c   : > { %v1777_v38 = vrot.slane %v1737_v37, 7 }
 0x88e   : > { %v1739_v40 = vpop.permute.xlu1 %1738  ;;  %1778 = vrot.lane.b32.xlu1 %v1777_v38, %s3904_s24 }
 0x88f   : > { %v1744_v41 = vsel %vm1213_vm7, %v1739_v40, %v1742_v34 }
 0x890   : > { %v1782_v42 = vrot.slane %v1744_v41, 7  ;;  %2982 = vmatmul.mubr.msk.f32.vlgmr.msra.gmra.mrb[6].mxu0 %vm1274_vm2, %v1809_v16 }
 0x891   : > { %3002 = vmatprep.mubr.msk.f32.mxu0 %vm3871_vm1, %v3872_v22 }
 0x892   : > { %v1746_v43 = vpop.permute.xlu1 %1745  ;;  %1783 = vrot.lane.b32.xlu0 %v1782_v42, %s3904_s24 }
 0x893   : > { %v1751_v44 = vsel %vm1221_vm8, %v1746_v43, %v1749_v39 }
 0x894   : > { %v1787_v46 = vrot.slane %v1751_v44, 7 }
 0x896   : > { %v1753_v47 = vpop.permute.xlu1 %1752  ;;  %1788 = vrot.lane.b32.xlu1 %v1787_v46, %s3904_s24 }
 0x897   : > { %v1758_v48 = vsel %vm4979_vm6, %v1753_v47, %v1756_v45  ;;  %vm4980_vm6 = vcmask 1042432  }
 0x898   : > { %v1792_v49 = vrot.slane %v1758_v48, 7 }
 0x89a   : > { %v1760_v51 = vpop.permute.xlu1 %1759  ;;  %1793 = vrot.lane.b32.xlu0 %v1792_v49, %s3904_s24 }
 0x89b   : > { %v1765_v53 = vsel %vm1237_vm14, %v1760_v51, %v1763_v50 }
 0x89c   : > { %v1797_v54 = vrot.slane %v1765_v53, 7 }
 0x89e   : > { %1798 = vrot.lane.b32.xlu1 %v1797_v54, %s3904_s24  ;;  %s3906_s24 = smov 104  }
 0x8f8   : > { %v1769_v55 = vpop.permute.xlu1 %1768 }
 0x8f9   : > { %v1801_v59 = vsel %vm1260_vm10, %v4516_v11, %v1769_v55 }
 0x8fc   : > { %v1774_v56 = vpop.permute.xlu0 %1773 }
 0x8fd   : > { %v1802_v60 = vsel %vm1262_vm11, %v1801_v59, %v1774_v56 }
 0x900   : > { %v1779_v57 = vpop.permute.xlu1 %1778 }
 0x901   : > { %v1803_v0 = vsel %vm4980_vm6, %v1802_v60, %v1779_v57 }
 0x904   : > { %v1784_v58 = vpop.permute.xlu0 %1783 }
 0x905   : > { %v1804_v2 = vsel %vm1266_vm13, %v1803_v0, %v1784_v58 }
 0x908   : > { %v1789_v62 = vpop.permute.xlu1 %1788 }
 0x909   : > { %v1805_v4 = vsel %vm1268_vm15, %v1804_v2, %v1789_v62 }
 0x90c   : > { %v1794_v1 = vpop.permute.xlu0 %1793 }
 0x90d   : > { %v1806_v5 = vsel %vm1270_vm0, %v1805_v4, %v1794_v1 }
 0x910   : > { %v1799_v6 = vpop.permute.xlu1 %1798 }
 0x911   : > { %v1807_v7 = vsel %vm1272_vm9, %v1806_v5, %v1799_v6 }
 0x912   : > { %1815 = vrot.lane.b32.xlu0 %v1807_v7, %s3905_s1  ;;  %s3915_s1 = smov 77  }
 0x95b   : > { %v4699_v9 = vpop.f32.mrb[4].mxu0 }
 0x95c   : > { %v2976_v10 = vpop.f32.mrb[5].mxu0 }
 0x963   : > { %v1890_v12 = vpop.f32.mrb[6].mxu0 }
 0x964   : > { %v2983_v14 = vpop.f32.mrb[7].mxu0 }
 0x984   : > { %v1816_v15 = vpop.permute.xlu0 %1815 }
 0x985   : > { %v1891_v16 = vadd.f32 %v1890_v12, %v1816_v15 }
 0x987   : > { %v1894_v18 = vadd.f32 %v1891_v16, %v4559_v52 }
 0x989   : > { %v1895_v19 = vsel %vm1355_vm12, %v1894_v18, -inf }
 0x98a   : > { %1896 = vmax.xlane.f32.xlu1 %v1895_v19 }
 0x99b   : > { %3365 = vrot.lane.b32.xlu1 %v4502_v63, %s3906_s24 }
 0x99f   : > { %2082 = vrot.lane.b32.xlu1 %v4507_v3, %s3906_s24 }
 0x9a3   : > { %1994 = vrot.lane.b32.xlu1 %v4523_v13, %s3897_s6  ;;  %s3907_s6 = smov 61  }
 0x9a7   : > { %2001 = vrot.lane.b32.xlu1 %v4523_v13, %s3898_s27  ;;  %s3908_s27 = smov 62  }
 0x9ab   : > { %2008 = vrot.lane.b32.xlu1 %v4523_v13, %s3899_s23  ;;  %s3909_s23 = smov 63  }
 0x9af   : > { %2015 = vrot.lane.b32.xlu1 %v4523_v13, %s3900_s5  ;;  %s3910_s5 = smov 64  }
 0x9b3   : > { %2022 = vrot.lane.b32.xlu1 %v4523_v13, %s3901_s7  ;;  %s3911_s7 = smov 65  }
 0x9b7   : > { %2029 = vrot.lane.b32.xlu1 %v4523_v13, %s3902_s4  ;;  %s3912_s4 = smov 66  }
 0x9bb   : > { %2036 = vrot.lane.b32.xlu1 %v4523_v13, %s3903_s9  ;;  %s3913_s9 = smov 67  }
 0xa17   : > { %v1897_v63 = vpop.xlane.xlu1 %1896 }
 0xa18   : > { %v1898_v3 = vsub.f32 %v1894_v18, %v1897_v63 }
 0xa1a   : > { %v1899_v20 = vmul.f32 1.442695, %v1898_v3 }
 0xa1b   : > { %v3366_v13 = vpop.permute.xlu1 %3365 }
 0xa1c   : > { %3386 = vpow2.f32 %v1899_v20  ;;  %v3368_v37 = vunpack.i.h.bf16 %v3366_v13  ;;  %v3367_v38 = vunpack.i.l.bf16 %v3366_v13 }
 0xa1e   : > { %v3096_v44 = vpack.c.bf16 %v3368_v37, %v3367_v38  ;;  %v2266_v38 = vld [vmem:[#allocation15] sm:$0xff] }
 0xa1f   : > { %v2083_v24 = vpop.permute.xlu1 %2082 }
 0xa23   : > { %v1995_v25 = vpop.permute.xlu1 %1994 }
 0xa26   : > { %v3387_v21 = vpop.eup %3386 }
 0xa27   : > { %v1901_v23 = vsel %vm1355_vm12, %v3387_v21, 0.0  ;;  %v2002_v27 = vpop.permute.xlu1 %2001 }
 0xa28   : > { %1902 = vadd.xlane.f32.xlu0 %v1901_v23 }
 0xa2b   : > { %v2009_v32 = vpop.permute.xlu1 %2008 }
 0xa2f   : > { %v2016_v42 = vpop.permute.xlu1 %2015 }
 0xa33   : > { %v2023_v48 = vpop.permute.xlu1 %2022 }
 0xa37   : > { %v2030_v55 = vpop.permute.xlu1 %2029 }
 0xa3b   : > { %v2037_v59 = vpop.permute.xlu1 %2036 }
 0xa3e   : > { %3360 = vrot.lane.b32.xlu0 %v4511_v8, %s3874_s8  ;;  %s3914_s8 = smov 51  }
 0xa42   : > { %1991 = vrot.lane.b32.xlu0 %v4516_v11, %s3907_s6  ;;  %s3916_s6 = smov 16  }
 0xa46   : > { %1998 = vrot.lane.b32.xlu0 %v4516_v11, %s3908_s27  ;;  %s3917_s27 = smov 8  }
 0xa4a   : > { %2005 = vrot.lane.b32.xlu0 %v4516_v11, %s3909_s23 }
 0xa4e   : > { %2012 = vrot.lane.b32.xlu0 %v4516_v11, %s3910_s5  ;;  %s4987_s5 = sld [smem:[#allocation44_spill]] }
 0xa52   : > { %2019 = vrot.lane.b32.xlu0 %v4516_v11, %s3911_s7 }
 0xa56   : > { %2026 = vrot.lane.b32.xlu0 %v4516_v11, %s3912_s4 }
 0xa5a   : > { %2033 = vrot.lane.b32.xlu0 %v4516_v11, %s3913_s9 }
 0xab5   : > { %v1903_v26 = vpop.xlane.xlu0 %1902 }
 0xab6   : > { %3388 = vrcp.f32 %v1903_v26 }
 0xab9   : > { %v3361_v28 = vpop.permute.xlu0 %3360 }
 0xaba   : > { %v3363_v29 = vunpack.i.h.bf16 %v3361_v28  ;;  %v3362_v30 = vunpack.i.l.bf16 %v3361_v28 }
 0xabc   : > { %v3093_v31 = vpack.c.bf16 %v3363_v29, %v3362_v30 }
 0xabd   : > { %v1992_v33 = vpop.permute.xlu0 %1991 }
 0xabe   : > { %v1997_v34 = vsel %vm1189_vm4, %v1992_v33, %v1995_v25  ;;  %3094 = vmatpush3.bf16.msra.mxu1 %v3093_v31  ;;  %vm4981_vm4 = vcmask 23552  }
 0xabf   : > { %v2041_v35 = vrot.slane %v1997_v34, 7  ;;  %3095 = vmatprep.subr.bf16.mxu1 %v3870_v17 }
 0xac0   : > { %v3389_v36 = vpop.eup %3388 }
 0xac1   : > { %v1905_v39 = vmul.f32 %v3389_v36, %v3387_v21  ;;  %v1999_v40 = vpop.permute.xlu0 %1998  ;;  %2042 = vrot.lane.b32.xlu0 %v2041_v35, %s3914_s8 }
 0xac2   : > { %v2004_v41 = vsel %vm1197_vm5, %v1999_v40, %v2002_v27  ;;  %vm1989_vm5 = vcmask 195712  }
 0xac3   : > { %v2046_v43 = vrot.slane %v2004_v41, 7  ;;  %2989 = vmatmul.mubr.msk.f32.vlgmr.msra.gmra.mrb[10].mxu1 %vm1355_vm12, %v1905_v39  ;;  %v2267_v39 = vld [vmem:[#allocation15 + $0x8] sm:$0xff]  ;;  %v2268_v41 = vld [vmem:[#allocation15 + $0x10] sm:$0xff] }
 0xac4   : > { %2995 = vmatprep.mubr.msk.f32.mxu1 %vm3871_vm1, %v3872_v22  ;;  %v3103_v40 = vpack.c.bf16 %v2267_v39, %v2266_v38 }
 0xac5   : > { %v2006_v45 = vpop.permute.xlu0 %2005  ;;  %2047 = vrot.lane.b32.xlu1 %v2046_v43, %s3914_s8 }
 0xac6   : > { %v2011_v46 = vsel %vm4981_vm4, %v2006_v45, %v2009_v32 }
 0xac7   : > { %v2051_v47 = vrot.slane %v2011_v46, 7  ;;  %3098 = vmatpush3.bf16.xpose.msk.msra.mxu1 %vm4498_vm3, %v3096_v44  ;;  %vm4982_vm3 = vcmask 48128  }
 0xac8   : > { %3108 = vmatprep.subr.bf16.mxu1 %v3870_v17 }
 0xac9   : > { %v2013_v49 = vpop.permute.xlu0 %2012  ;;  %2052 = vrot.lane.b32.xlu0 %v2051_v47, %s3914_s8  ;;  %v2827_v47 = vld [vmem:[#allocation17] ss:$0 sm:$0xff] }
 0xaca   : > { %v2018_v50 = vsel %vm1213_vm7, %v2013_v49, %v2016_v42  ;;  %vm2263_vm7 = vcmask 261312  }
 0xacb   : > { %v2056_v51 = vrot.slane %v2018_v50, 7 }
 0xacd   : > { %v2020_v53 = vpop.permute.xlu0 %2019  ;;  %2057 = vrot.lane.b32.xlu1 %v2056_v51, %s3914_s8  ;;  %v3396_v51 = vld [vmem:[%s4432_s19 + $0x8] sm:$0xff]  ;;  %s4990_s19 = sshll.u32 %s4391_s10, 3 }
 0xace   : > { %v2025_v54 = vsel %vm1221_vm8, %v2020_v53, %v2023_v48  ;;  %2996 = vmatmul.mubr.msk.f32.vlgmr.msra.gmra.mrb[12].mxu1 %vm1274_vm2, %v2083_v24  ;;  %vm4983_vm2 = vmmov %vm4980_vm6  ;;  %vm4984_vm8 = vcmask 261120   ;;  %s788_s23 = scalar_lea.vmem [#allocation24], %s4990_s19 }
 0xacf   : > { %v2061_v56 = vrot.slane %v2025_v54, 7  ;;  %3024 = vmatprep.mubr.msk.f32.mxu1 %vm3871_vm1, %v3872_v22  ;;  %s2570_s7 = sshll.u32 %s788_s23, 4  ;;  %s4821_s7 = int_to_ptr.vmem [resolvable:$true] %s2570_s7 }
 0xad1   : > { %v2027_v61 = vpop.permute.xlu0 %2026  ;;  %2062 = vrot.lane.b32.xlu0 %v2061_v56, %s3914_s8 }
 0xad2   : > { %v2032_v57 = vsel %vm4982_vm3, %v2027_v61, %v2030_v55 }
 0xad3   : > { %v2066_v58 = vrot.slane %v2032_v57, 7 }
 0xad5   : > { %v2034_v60 = vpop.permute.xlu0 %2033  ;;  %2067 = vrot.lane.b32.xlu1 %v2066_v58, %s3914_s8 }
 0xad6   : > { %v2039_v62 = vsel %vm1237_vm14, %v2034_v60, %v2037_v59  ;;  %v2380_v59 = vld [vmem:[#allocation21] sm:$0xff]  ;;  %v2381_v60 = vld [vmem:[#allocation21 + $0x8] sm:$0xff] }
 0xad7   : > { %v2071_v0 = vrot.slane %v2039_v62, 7  ;;  %v3109_v62 = vpack.c.bf16 %v2381_v60, %v2380_v59 }
 0xad9   : > { %2072 = vrot.lane.b32.xlu0 %v2071_v0, %s3914_s8  ;;  %3110 = vmatpush3.bf16.msra.mxu1 %v3109_v62  ;;  %v2383_v0 = vld [vmem:[#allocation21 + $0x18] sm:$0xff]  ;;  %s4991_s8 = sld [smem:[#allocation46_spill]] }
 0xada   : > { %3111 = vmatprep.subr.bf16.mxu1 %v3870_v17 }
 0xb33   : > { %v2043_v1 = vpop.permute.xlu0 %2042 }
 0xb34   : > { %v2075_v6 = vsel %vm1260_vm10, %v4516_v11, %v2043_v1  ;;  %vm4986_vm10 = vmmov %vm4984_vm8 }
 0xb37   : > { %v2048_v2 = vpop.permute.xlu1 %2047 }
 0xb38   : > { %v2076_v7 = vsel %vm1262_vm11, %v2075_v6, %v2048_v2  ;;  %v2465_v2 = vld [vmem:[%s4987_s5] sm:$0xff]  ;;  %vm2480_vm11 = vcmask 523264  }
 0xb3b   : > { %v2053_v4 = vpop.permute.xlu0 %2052 }
 0xb3c   : > { %v2077_v12 = vsel %vm4983_vm2, %v2076_v7, %v2053_v4  ;;  %v2466_v4 = vld [vmem:[%s4987_s5 + $0x8] sm:$0xff]  ;;  %v2468_v7 = vld [vmem:[%s4987_s5 + $0x18] sm:$0xff] }
 0xb3d   : > { %v3115_v6 = vpack.c.bf16 %v2466_v4, %v2465_v2 }
 0xb3f   : > { %v2058_v5 = vpop.permute.xlu1 %2057 }
 0xb40   : > { %v2078_v15 = vsel %vm1266_vm13, %v2077_v12, %v2058_v5  ;;  %v2467_v5 = vld [vmem:[%s4987_s5 + $0x10] sm:$0xff]  ;;  %v2469_v12 = vld [vmem:[%s4987_s5 + $0x20] sm:$0xff] }
 0xb43   : > { %v2063_v10 = vpop.permute.xlu0 %2062 }
 0xb44   : > { %v2079_v16 = vsel %vm1268_vm15, %v2078_v15, %v2063_v10  ;;  %v3118_v10 = vpack.c.bf16 %v2468_v7, %v2467_v5 }
 0xb47   : > { %v2068_v14 = vpop.permute.xlu1 %2067 }
 0xb48   : > { %v2080_v18 = vsel %vm1270_vm0, %v2079_v16, %v2068_v14  ;;  %vm1715_vm0 = vcmask 130112   ;;  %v2470_v14 = vld [vmem:[%s4987_s5 + $0x28] sm:$0xff] }
 0xb49   : > { %v3121_v15 = vpack.c.bf16 %v2470_v14, %v2469_v12 }
 0xb4b   : > { %v2073_v19 = vpop.permute.xlu0 %2072 }
 0xb4c   : > { %v2081_v63 = vsel %vm1272_vm9, %v2080_v18, %v2073_v19  ;;  %vm4985_vm9 = vmmov %vm4984_vm8 }
 0xb4d   : > { %2089 = vrot.lane.b32.xlu1 %v2081_v63, %s3915_s1  ;;  %s2557_s1 = scalar_lea.sflag [#allocation5], %s4391_s10 }
 0xb96   : > { %v1981_v3 = vpop.f32.mrb[10].mxu1 }
 0xb97   : > { %v2990_v20 = vpop.f32.mrb[11].mxu1 }
 0xba1   : > { %v2164_v11 = vpop.f32.mrb[12].mxu1 }
 0xba2   : > { %v2997_v21 = vpop.f32.mrb[13].mxu1 }
 0xbbf   : > { %v2090_v23 = vpop.permute.xlu1 %2089 }
 0xbc0   : > { %v2165_v13 = vadd.f32 %v2164_v11, %v2090_v23  ;;  %v2830_v11 = vld [vmem:[#allocation20] ss:$0 sm:$0xff] }
 0xbc2   : > { %v2168_v24 = vadd.f32 %v2165_v13, %v4559_v52  ;;  %v2471_v13 = vld [vmem:[%s4987_s5 + $0x30] sm:$0xff] }
 0xbc4   : > { %v2169_v25 = vsel %vm1355_vm12, %v2168_v24, -inf }
 0xbc5   : > { %2170 = vmax.xlane.f32.xlu0 %v2169_v25  ;;  %v2831_v25 = vld [vmem:[#allocation23] ss:$0 sm:$0xff] }
 0xbdb   : > { %3370 = vrot.lane.b32.xlu0 %v4511_v8, %s3906_s24  ;;  %s3918_s24 = smov 24  }
 0xbdf   : > { %1986 = vrot.lane.b32.xlu0 %v1981_v3, %s3916_s6  ;;  %v2829_v3 = vld [vmem:[#allocation18] ss:$0 sm:$0xff]  ;;  %s3919_s6 = smov [#allocation24]  }
 0xc52   : > { %v2171_v26 = vpop.xlane.xlu0 %2170 }
 0xc53   : > { %v2172_v27 = vsub.f32 %v2168_v24, %v2171_v26 }
 0xc55   : > { %v2173_v28 = vmul.f32 1.442695, %v2172_v27 }
 0xc56   : > { %v3371_v29 = vpop.permute.xlu0 %3370 }
 0xc57   : > { %3390 = vpow2.f32 %v2173_v28  ;;  %v3373_v30 = vunpack.i.h.bf16 %v3371_v29  ;;  %v3372_v31 = vunpack.i.l.bf16 %v3371_v29 }
 0xc59   : > { %v3100_v32 = vpack.c.bf16 %v3373_v30, %v3372_v31 }
 0xc5a   : > { %v1987_v35 = vpop.permute.xlu0 %1986 }
 0xc5b   : > { %3101 = vmatpush3.bf16.msra.mxu0 %v3100_v32 }
 0xc5c   : > { %3102 = vmatprep.subr.bf16.mxu0 %v3870_v17 }
 0xc61   : > { %v3391_v52 = vpop.eup %3390 }
 0xc62   : > { %v2175_v33 = vsel %vm1355_vm12, %v3391_v52, 0.0 }
 0xc63   : > { %2176 = vadd.xlane.f32.xlu1 %v2175_v33 }
 0xc74   : > { %1712 = vrot.lane.b32.xlu1 %v4699_v9, %s3917_s27  ;;  %v2269_v9 = vld [vmem:[#allocation15 + $0x18] sm:$0xff]  ;;  %s4989_s27 = sld [smem:[#allocation45_spill]] }
 0xc75   : > { %v3106_v42 = vpack.c.bf16 %v2269_v9, %v2268_v41 }
 0xc7a   : > { %v2833_v30 = vld [vmem:[%s4989_s27] ss:$0 sm:$0xff]  ;;  %s3767_s27 = sshll.u32 %s3919_s6, 4  ;;  %s3768_s27 = int_to_ptr.vmem [resolvable:$false] %s3767_s27 }
 0xc7b   : > { %s3769_s19 = scalar_lea.vmem %s3768_s27, 256  ;;  %p3770_p8 = scmp.lt.s32.totalorder %s4821_s7, %s3768_s27 }
 0xcf0   : > { %v2177_v8 = vpop.xlane.xlu1 %2176 }
 0xcf1   : > { %3392 = vrcp.f32 %v2177_v8 }
 0xcf4   : > { %v1713_v34 = vpop.permute.xlu1 %1712 }
 0xcf5   : > { %1716 = vst.msk [vmem:[#allocation2] sm:$0xff] %vm1715_vm0, %v1713_v34 }
 0xcf6   : > { %1990 = vst.msk [vmem:[#allocation2] sm:$0xff] %vm1989_vm5, %v1987_v35 }
 0xcfb   : > { %v3393_v36 = vpop.eup %3392 }
 0xcfc   : > { %v2179_v37 = vmul.f32 %v3393_v36, %v3391_v52 }
 0xcfe   : > { %3003 = vmatmul.mubr.msk.f32.vlgmr.msra.gmra.mrb[8].mxu0 %vm1355_vm12, %v2179_v37 }
 0xcff   : > { %3013 = vmatprep.mubr.msk.f32.mxu0 %vm3871_vm1, %v3872_v22  ;;  %3104 = vmatpush3.bf16.msra.mxu0 %v3103_v40 }
 0xd00   : > { %3105 = vmatprep.subr.bf16.mxu0 %v3870_v17 }
 0xd03   : > { %3107 = vmatpush3.bf16.msra.mxu0 %v3106_v42 }
 0xd04   : > { %3114 = vmatprep.subr.bf16.mxu0 %v3870_v17 }
 0xdd1   : > { %v2255_v43 = vpop.f32.mrb[8].mxu0 }
 0xdd2   : > { %2260 = vrot.lane.b32.xlu1 %v2255_v43, %s3918_s24  ;;  %v3004_v44 = vpop.f32.mrb[9].mxu0  ;;  %s2836_s24 = sshll.u32 %s4041_s2, 7  ;;  %s3763_s2 = scalar_lea.vmem %s4821_s7, 128 }
 0xdd3   : > { %p3764_p3 = scmp.ne.s32.totalorder %s4821_s7, %s3763_s2  ;;  %p3771_p5 = scmp.lt.s32.totalorder %s3769_s19, %s3763_s2 }
 0xdd5   : > { %p3765_p11 = pnand %p3764_p3, %p4993_p10  ;;  %p3772_p7 = por %p3771_p5, %p3770_p8 }
 0xdd7   : > { %p3766_p12 = pneg %p3765_p11 }
 0xdd9   : > { %p3773_p6 = pnand %p3772_p7, %p3766_p12 }
 0xe44   : > { %v2261_v45 = vpop.permute.xlu1 %2260 }
 0xe45   : > { %2264 = vst.msk [vmem:[#allocation2] sm:$0xff] %vm2263_vm7, %v2261_v45 }
 0xe4c   : > { %v2265_v46 = vld [vmem:[#allocation2] sm:$0xff] }
 0xe4d   : > { %3014 = vmatmul.mubr.msk.f32.vlgmr.msra.gmra.mrb[10].mxu0 %vm4984_vm8, %v2265_v46 }
 0xe4e   : > { %3043 = vmatprep.mubr.msk.f32.mxu0 %vm3871_vm1, %v3872_v22  ;;  %v2382_v22 = vld [vmem:[#allocation21 + $0x10] sm:$0xff]  ;;  %3116 = vmatpush3.bf16.msra.mxu0 %v3115_v6  ;;  %vm4988_vm1 = vmmov %vm4984_vm8 }
 0xe4f   : > { %v3112_v1 = vpack.c.bf16 %v2383_v0, %v2382_v22  ;;  %3117 = vmatprep.subr.bf16.mxu0 %v3870_v17  ;;  %vm4992_vm12 = vmmov %vm4988_vm1 }
 0xe51   : > { %3113 = vmatpush3.bf16.msra.mxu1 %v3112_v1 }
 0xe52   : > { %3119 = vmatpush3.bf16.msra.mxu0 %v3118_v10 }
 0xe53   : > { %3120 = vmatprep.subr.bf16.mxu0 %v3870_v17 }
 0xe56   : > { %3122 = vmatpush3.bf16.msra.mxu0 %v3121_v15 }
 0xe57   : > { %3123 = vmatprep.subr.bf16.mxu0 %v3870_v17  ;;  %v2472_v17 = vld [vmem:[%s4987_s5 + $0x38] sm:$0xff]  ;;  %s4819_s5 = scalar_lea.hbm %s4991_s8, %s2836_s24 }
 0xe58   : > { %v3124_v24 = vpack.c.bf16 %v2472_v17, %v2471_v13 }
 0xe5a   : > { %3125 = vmatpush3.bf16.msra.mxu0 %v3124_v24 }
 0xf20   : > { %v2346_v48 = vpop.f32.mrb[10].mxu0 }
 0xf21   : > { %v2347_v49 = vadd.f32 %v2827_v47, %v2346_v48  ;;  %v3015_v50 = vpop.f32.mrb[11].mxu0 }
 0xf23   : > { %v2350_v53 = vadd.f32 %v3396_v51, %v2347_v49 }
 0xf25   : > { %v2353_v54 = vsel %vm4985_vm9, %v2350_v53, 0.0 }
 0xf26   : > { %2354 = vadd.xlane.f32.xlu0 %v2353_v54 }
 0xfb3   : > { %v2355_v55 = vpop.xlane.xlu0 %2354 }
 0xfb4   : > { %v2356_v56 = vmul.f32 0.03125, %v2355_v55 }
 0xfb6   : > { %v2357_v61 = vsub.f32 %v2350_v53, %v2356_v56 }
 0xfb8   : > { %v2358_v57 = vmul.f32 %v2357_v61, %v2357_v61 }
 0xfba   : > { %v2359_v58 = vsel %vm4986_vm10, %v2358_v57, 0.0 }
 0xfbb   : > { %2360 = vadd.xlane.f32.xlu1 %v2359_v58 }
0x1048   : > { %v2361_v16 = vpop.xlane.xlu1 %2360 }
0x1049   : > { %v2362_v18 = vmul.f32 0.03125, %v2361_v16 }
0x104b   : > { %v2363_v19 = vadd.f32 1e-05, %v2362_v18 }
0x104d   : > { %3394 = vrsqrt.f32 %v2363_v19 }
0x1057   : > { %v3395_v63 = vpop.eup %3394 }
0x1058   : > { %v2365_v20 = vmul.f32 %v3395_v63, %v2357_v61 }
0x105a   : > { %v2372_v21 = vmul.f32 %v2829_v3, %v2365_v20 }
0x105c   : > { %v2379_v23 = vadd.f32 %v2830_v11, %v2372_v21 }
0x105e   : > { %3025 = vmatmul.mubr.msk.f32.vlgmr.msra.gmra.mrb[14].mxu1 %vm4988_vm1, %v2379_v23 }
0x1131   : > { %v2460_v26 = vpop.f32.mrb[14].mxu1 }
0x1132   : > { %v2461_v27 = vadd.f32 %v2831_v25, %v2460_v26  ;;  %v3026_v28 = vpop.f32.mrb[15].mxu1 }
0x1134   : > { %v2464_v29 = vmax.f32 %v2461_v27, 0.0 }
0x1136   : > { %3044 = vmatmul.mubr.msk.f32.vlgmr.msra.gmra.mrb[12].mxu0 %vm2480_vm11, %v2464_v29 }
0x1209   : > { %v2550_v31 = vpop.f32.mrb[12].mxu0 }
0x120a   : > { %v2551_v32 = vadd.f32 %v2833_v30, %v2550_v31  ;;  %v3045_v52 = vpop.f32.mrb[13].mxu0 }
0x120c   : > { %v2554_v33 = vadd.f32 %v2551_v32, %v2350_v53 }
0x120e   : > { %2555 = vst.msk [vmem:[%s788_s23] sm:$0xff] %vm4992_vm12, %v2554_v33 }
0x120f   : > { %3776 = shalt.err (!%p3773_p6)
}
0x1210   : > { %s3777_s10 = scalar_lea.hbm %s4819_s5, 128  ;;  %s3781_s4 = scalar_lea.hbm %s4991_s8, 256 }
0x1211   : > { %p3778_p9 = scmp.ne.s32.totalorder %s4819_s5, %s3777_s10  ;;  %p3782_p13 = scmp.lt.u32.totalorder %s4819_s5, %s4991_s8 }
0x1212   : > { %p3783_p0 = scmp.lt.u32.totalorder %s3781_s4, %s3777_s10  ;;  %p3785_p3 = scmp.lt.u32.totalorder %s3777_s10, %s4819_s5 }
0x1213   : > { %p3779_p4 = pnand %p3778_p9, %p4993_p10 }
0x1214   : > { %p3784_p2 = por %p3783_p0, %p3782_p13 }
0x1215   : > { %p3780_p1 = pneg %p3779_p4 }
0x1216   : > { %p3786_p11 = por %p3785_p3, %p3784_p2 }
0x1218   : > { %p3787_p12 = pnand %p3786_p11, %p3780_p1 }
0x121a   : > { %3790 = shalt.err (!%p3787_p12)
}
0x121b   : > { %3176 = dma.vmem_to_hbm [thread:$0]  (%p4993_p10), %s4821_s7, 128, %s4819_s5, %s2557_s1  }
0x121c PF: > { %s2582_s2 = sand.u32 1, %s3841_s0   ;;  %p4994_p8 = scmp.ne.s32.totalorder %s4945_s28, 0 }
0x121d   : > { %p4995_p5 = scmp.ge.s32.totalorder %s3853_s21, 2  ;;  %s2583_s27 = scalar_lea.sflag [#allocation5], %s2582_s2 }
0x121f   : > { %p3220_p7 = pnand %p4995_p5, %p4994_p8 }
0x1221   : > { %3836 = dma.done.wait (!%p3220_p7), %s2583_s27, 128  }
0x1222   : > { %3838 = vsyncadd (!%p3220_p7), %s2583_s27, 4294967168  ;;  %p38_p6 = scmp.ge.s32.totalorder %s4315_s3, 4   ;;  %s4996_s0 = smov %s3845_s30 }
0x1223   : > { %s4997_s30 = smov %s3849_s20  ;;  %s4998_s20 = smov %s4326_s26 }
0x1224   : > { %s4999_s21 = smov %s4315_s3  ;;  %40 = sbr.rel (!%p38_p6) target bundleno = 26 (0x1a), region = 192 }
0x122b   :  { %2588 = vsyncpa [#allocation4], 1 }
0x122c   :  { %2590 = vsyncpa [#allocation4 + $0x1], 1 }
0x122d   :  { %2591 = vsyncpa [#allocation7], 1 }
0x122e   :  { %2592 = vsyncpa [#allocation10], 1 }
0x122f   :  { %2593 = vsyncpa [#allocation13], 1 }
0x1230   :  { %2594 = vsyncpa [#allocation16], 1 }
0x1231   :  { %2595 = vsyncpa [#allocation19], 1 }
0x1232   :  { %2596 = vsyncpa [#allocation22], 1 }
0x1233   :  { %2597 = vsyncpa [#allocation5], 1 }
0x1234   :  { %2599 = vsyncpa [#allocation5 + $0x1], 1 }

</bundles_post_ra>
